<compile_context>
chip_gen: v6e
topology: v6e:2x2x1
jax: 0.10.0
libtpu: 0.0.40
codegen_flags: <defaults>
</compile_context>

<pallas_src>
import functools

import jax
import jax.numpy as jnp
from jax.experimental import pallas as pl
from jax.experimental.pallas import tpu as pltpu

_EPS = 1e-5
_DILATIONS = (6, 12, 18)
_GN_GROUPS = 16


# ---------------------------------------------------------------------------
# Pallas kernel: fused ASPP branches + final 1x1 conv, one batch element.
# ---------------------------------------------------------------------------
def _aspp_kernel(x_ref, w0_ref, wd_ref, bb_ref, wf_ref, bf_ref, o_ref,
                 col_ref, acc_ref, *, H, W, HW, dilations):
    """Refs:
      x_ref   : (1, C_in, HWp)      image, channels on sublanes, flat HW on lanes
      w0_ref  : (C_out, C_in)       1x1 branch weights (BN folded)
      wd_ref  : (3, C_out, 9*C_in)  dilated 3x3 branch weights, taps stacked on K
      bb_ref  : (4, C_out, 1)       per-branch folded-BN biases (f32)
      wf_ref  : (4, C_out, C_out)   final 1x1 conv, split per concat branch
      bf_ref  : (1, C_out, 1)       per-batch bias (pool branch + final BN, f32)
      o_ref   : (1, C_out, HWp)     output
      col_ref : VMEM (9*C_in, HWp)  im2col scratch (compute dtype)
      acc_ref : VMEM (C_out, HWp)   f32 output accumulator
    """
    C_in = x_ref.shape[1]
    HWp = x_ref.shape[2]
    x = x_ref[0]
    cdtype = x.dtype

    # hoisted lane coordinates (reused by every tap mask)
    lane = jax.lax.broadcasted_iota(jnp.int32, (1, HWp), 1)
    wcol = lane % W                       # column coordinate of each position

    # Branch 0 (1x1 conv + folded BN + ReLU), folded straight into the f32
    # accumulator, which starts at the per-batch (pool-branch + final-BN) bias.
    b0 = jnp.maximum(
        jnp.dot(w0_ref[...], x, preferred_element_type=jnp.float32) + bb_ref[0],
        0.0).astype(cdtype)
    acc_ref[...] = (jnp.dot(wf_ref[0], b0, preferred_element_type=jnp.float32)
                    + bf_ref[0])

    # Branches 1..3: dilated 3x3 conv.  One stacked matmul per branch
    # (K = 9*C_in) against an im2col scratch built with lane-rolls + masks,
    # then folded into the accumulator right away.
    for j, d in enumerate(dilations):
        for ky in range(3):
            for kx in range(3):
                t = ky * 3 + kx
                dy, dx = (ky - 1) * d, (kx - 1) * d
                if abs(dy) >= H or abs(dx) >= W:
                    # tap lies entirely inside the zero padding
                    col_ref[t * C_in:(t + 1) * C_in, :] = jnp.zeros(
                        (C_in, HWp), cdtype)
                    continue
                s = dy * W + dx           # flattened-lane offset of this tap
                # shifted[:, p] = x[:, (p + s) mod HWp]  (XLU rotate, not a copy)
                shifted = x if s == 0 else pltpu.roll(x, (-s) % HWp, axis=1)
                valid = None
                if dx != 0:               # mask row wrap-around
                    valid = (wcol + dx >= 0) & (wcol + dx < W)
                if dy != 0:               # mask vertical over/underflow
                    vr = (lane + s >= 0) & (lane + s < HW)
                    valid = vr if valid is None else (valid & vr)
                if valid is not None:
                    shifted = jnp.where(valid, shifted, jnp.zeros_like(shifted))
                col_ref[t * C_in:(t + 1) * C_in, :] = shifted

        bj = jnp.maximum(
            jnp.dot(wd_ref[j], col_ref[...],
                    preferred_element_type=jnp.float32) + bb_ref[j + 1],
            0.0).astype(cdtype)
        acc_ref[...] += jnp.dot(wf_ref[j + 1], bj,
                                preferred_element_type=jnp.float32)

    o_ref[0] = jnp.maximum(acc_ref[...], 0.0).astype(o_ref.dtype)


# ---------------------------------------------------------------------------
# Wrapper: BN folding, pool branch, lane padding, pallas_call.
# ---------------------------------------------------------------------------
def _fold_bn(bn):
    a = bn["gamma"] * jax.lax.rsqrt(bn["var"] + _EPS)
    return a, bn["beta"] - a * bn["mean"]


@functools.partial(jax.jit, static_argnames=("compute_dtype",))
def aspp_forward(x, p, *, compute_dtype=jnp.bfloat16):
    """ASPP forward.  x is NCHW (N, C_in, H, W); returns (N, C_out, H, W)."""
    N, C_in, H, W = x.shape
    C_out = p["w0"].shape[0]
    HW = H * W
    HWp = ((HW + 127) // 128) * 128       # lane-dense flattened spatial axis
    cdtype = jnp.dtype(compute_dtype)
    hp = jax.lax.Precision.HIGHEST

    # ---- fold BatchNorm (eval mode) into conv weights ---------------------
    a0, b0 = _fold_bn(p["bn0"])
    w0_e = (p["w0"] * a0[:, None]).astype(cdtype)                 # (C_out, C_in)
    branch_bias = [b0]
    wd_list = []
    for wname, bnname in (("w1", "bn1"), ("w2", "bn2"), ("w3", "bn3")):
        a, b = _fold_bn(p[bnname])
        we = p[wname] * a[:, None, None, None]                    # (C_out,C_in,3,3)
        # stack the 9 taps along the contraction axis (matches im2col layout)
        wd_list.append(jnp.transpose(we, (0, 2, 3, 1)).reshape(C_out, 9 * C_in))
        branch_bias.append(b)
    wd = jnp.stack(wd_list).astype(cdtype)                        # (3,C_out,9*C_in)
    bb = jnp.stack(branch_bias)[:, :, None].astype(jnp.float32)   # (4, C_out, 1)

    af, bf = _fold_bn(p["bnf"])
    wf_e = p["wf"] * af[:, None]                                  # (C_out, 5*C_out)
    wf_parts = jnp.stack(
        [wf_e[:, j * C_out:(j + 1) * C_out] for j in range(4)]).astype(cdtype)
    wf4 = wf_e[:, 4 * C_out:]                                     # (C_out, C_out)

    # ---- global-average-pool branch (global reduction -> plain JAX glue) --
    pooled = jnp.mean(x, axis=(2, 3))                             # (N, C_in)
    y = jnp.matmul(pooled, p["w_pool"].T, precision=hp)           # (N, C_out)
    yg = y.reshape(N, _GN_GROUPS, C_out // _GN_GROUPS)
    mu = jnp.mean(yg, axis=-1, keepdims=True)
    var = jnp.var(yg, axis=-1, keepdims=True)
    y = ((yg - mu) / jnp.sqrt(var + _EPS)).reshape(N, C_out)
    y = jnp.maximum(y * p["gn_gamma"] + p["gn_beta"], 0.0)
    # bilinear upsampling of a 1x1 map is constant over (H, W): fold its
    # contribution through the final 1x1 conv into a per-batch bias.
    bias_final = (jnp.matmul(y, wf4.T, precision=hp)
                  + bf[None, :])[:, :, None].astype(jnp.float32)  # (N, C_out, 1)

    # ---- NCHW -> (N, C_in, HWp): pure reshape + zero lane padding ----------
    x_flat = x.reshape(N, C_in, HW)
    if HWp != HW:
        x_flat = jnp.pad(x_flat, ((0, 0), (0, 0), (0, HWp - HW)))
    x_flat = x_flat.astype(cdtype)

    # ---- generation-aware VMEM budget & cost estimate ----------------------
    bpe = cdtype.itemsize
    blk_bytes = (C_in * HWp * bpe                                 # x block
                 + C_out * HWp * 4                                # out block
                 + (C_out * C_in + 3 * C_out * 9 * C_in
                    + 4 * C_out * C_out) * bpe                    # weights
                 + (4 * C_out + C_out) * 4)                       # biases
    scratch_bytes = 9 * C_in * HWp * bpe + C_out * HWp * 4
    try:
        vmem_cap = int(pltpu.get_tpu_info().vmem_capacity_bytes)
    except Exception:
        vmem_cap = 64 * 1024 * 1024                               # conservative
    vmem_limit = int(max(32 * 1024 * 1024,
                         min(2 * blk_bytes + scratch_bytes + (16 << 20),
                             vmem_cap - (8 << 20),
                             100 << 20)))

    flops = 2 * N * HWp * C_out * (C_in + 3 * 9 * C_in + 4 * C_out)
    bytes_accessed = (N * C_in * HWp * bpe + N * C_out * HWp * 4
                      + (C_out * C_in + 3 * C_out * 9 * C_in
                         + 4 * C_out * C_out) * bpe
                      + (4 * C_out + N * C_out) * 4)

    kernel = functools.partial(_aspp_kernel, H=H, W=W, HW=HW,
                               dilations=_DILATIONS)
    out_flat = pl.pallas_call(
        kernel,
        out_shape=jax.ShapeDtypeStruct((N, C_out, HWp), x.dtype),
        grid_spec=pltpu.PrefetchScalarGridSpec(
            num_scalar_prefetch=0,
            grid=(N,),
            in_specs=[
                pl.BlockSpec((1, C_in, HWp), lambda n: (n, 0, 0)),       # x
                pl.BlockSpec((C_out, C_in), lambda n: (0, 0)),           # w0
                pl.BlockSpec((3, C_out, 9 * C_in), lambda n: (0, 0, 0)), # wd
                pl.BlockSpec((4, C_out, 1), lambda n: (0, 0, 0)),        # bb
                pl.BlockSpec((4, C_out, C_out), lambda n: (0, 0, 0)),    # wf
                pl.BlockSpec((1, C_out, 1), lambda n: (n, 0, 0)),        # bias
            ],
            out_specs=pl.BlockSpec((1, C_out, HWp), lambda n: (n, 0, 0)),
            scratch_shapes=[pltpu.VMEM((9 * C_in, HWp), cdtype),
                            pltpu.VMEM((C_out, HWp), jnp.float32)],
        ),
        compiler_params=pltpu.CompilerParams(
            dimension_semantics=("parallel",),
            vmem_limit_bytes=vmem_limit),
        cost_estimate=pl.CostEstimate(flops=flops, transcendentals=0,
                                      bytes_accessed=bytes_accessed),
    )(x_flat, w0_e, wd, bb, wf_parts, bias_final)

    return out_flat[:, :, :HW].reshape(N, C_out, H, W)


# ---------------------------------------------------------------------------
# Pure-JAX reference (independent path via lax.conv_general_dilated).
# ---------------------------------------------------------------------------
def _conv2d(x, w, dilation):
    kh, kw = w.shape[2], w.shape[3]
    pad_h, pad_w = dilation * (kh // 2), dilation * (kw // 2)
    return jax.lax.conv_general_dilated(
        x, w, window_strides=(1, 1),
        padding=((pad_h, pad_h), (pad_w, pad_w)),
        rhs_dilation=(dilation, dilation),
        dimension_numbers=("NCHW", "OIHW", "NCHW"),
        precision=jax.lax.Precision.HIGHEST)


def _bn_inf(y, bn):
    a = bn["gamma"] / jnp.sqrt(bn["var"] + _EPS)
    b = bn["beta"] - a * bn["mean"]
    return y * a[None, :, None, None] + b[None, :, None, None]


def aspp_ref(x, p):
    relu = lambda t: jnp.maximum(t, 0.0)
    N, C_in, H, W = x.shape
    C_out = p["w0"].shape[0]

    x0 = relu(_bn_inf(_conv2d(x, p["w0"][:, :, None, None], 1), p["bn0"]))
    x1 = relu(_bn_inf(_conv2d(x, p["w1"], _DILATIONS[0]), p["bn1"]))
    x2 = relu(_bn_inf(_conv2d(x, p["w2"], _DILATIONS[1]), p["bn2"]))
    x3 = relu(_bn_inf(_conv2d(x, p["w3"], _DILATIONS[2]), p["bn3"]))

    pooled = jnp.mean(x, axis=(2, 3), keepdims=True)
    x4 = _conv2d(pooled, p["w_pool"][:, :, None, None], 1)        # (N,C_out,1,1)
    x4g = x4.reshape(N, _GN_GROUPS, C_out // _GN_GROUPS)
    mu = jnp.mean(x4g, axis=-1, keepdims=True)
    var = jnp.var(x4g, axis=-1, keepdims=True)
    x4 = ((x4g - mu) / jnp.sqrt(var + _EPS)).reshape(N, C_out)
    x4 = relu(x4 * p["gn_gamma"][None, :] + p["gn_beta"][None, :])
    x4 = jnp.broadcast_to(x4[:, :, None, None], (N, C_out, H, W))

    cat = jnp.concatenate([x0, x1, x2, x3, x4], axis=1)
    return relu(_bn_inf(_conv2d(cat, p["wf"][:, :, None, None], 1), p["bnf"]))


# ---------------------------------------------------------------------------
# Deterministic parameter construction.
# ---------------------------------------------------------------------------
def _bn_init(key, c):
    k = jax.random.split(key, 4)
    return {"gamma": 1.0 + 0.1 * jax.random.normal(k[0], (c,), jnp.float32),
            "beta": 0.1 * jax.random.normal(k[1], (c,), jnp.float32),
            "mean": 0.05 * jax.random.normal(k[2], (c,), jnp.float32),
            "var": jnp.abs(1.0 + 0.1 * jax.random.normal(k[3], (c,), jnp.float32))}


def make_params(key, C_in, C_out):
    ks = jax.random.split(key, 13)
    p = {}
    p["w0"] = 0.25 * jax.random.normal(ks[0], (C_out, C_in), jnp.float32)
    p["bn0"] = _bn_init(ks[1], C_out)
    p["w1"] = 0.15 * jax.random.normal(ks[2], (C_out, C_in, 3, 3), jnp.float32)
    p["bn1"] = _bn_init(ks[3], C_out)
    p["w2"] = 0.15 * jax.random.normal(ks[4], (C_out, C_in, 3, 3), jnp.float32)
    p["bn2"] = _bn_init(ks[5], C_out)
    p["w3"] = 0.15 * jax.random.normal(ks[6], (C_out, C_in, 3, 3), jnp.float32)
    p["bn3"] = _bn_init(ks[7], C_out)
    p["w_pool"] = 0.25 * jax.random.normal(ks[8], (C_out, C_in), jnp.float32)
    p["gn_gamma"] = 1.0 + 0.1 * jax.random.normal(ks[9], (C_out,), jnp.float32)
    p["gn_beta"] = 0.1 * jax.random.normal(ks[10], (C_out,), jnp.float32)
    p["wf"] = 0.1 * jax.random.normal(ks[11], (C_out, 5 * C_out), jnp.float32)
    p["bnf"] = _bn_init(ks[12], C_out)
    return p


if __name__ == "__main__":
    C_in, C_out = 16, 32          # C_out must be divisible by 16 (GroupNorm)
    N, H, W = 2, 16, 16

    key = jax.random.PRNGKey(0)
    kx, kp = jax.random.split(key)
    x = jax.random.normal(kx, (N, C_in, H, W), jnp.float32)
    params = make_params(kp, C_in, C_out)

    ref = aspp_ref(x, params)
    ref_scale = float(jnp.max(jnp.abs(ref)))

    # f32-compute path: structural correctness against the HIGHEST-prec ref.
    out_f32 = jax.block_until_ready(
        aspp_forward(x, params, compute_dtype=jnp.float32))
    assert out_f32.shape == (N, C_out, H, W)
    err_f32 = float(jnp.max(jnp.abs(out_f32 - ref)))
    assert err_f32 < 2e-2 * (1.0 + ref_scale), f"f32 max abs err {err_f32}"

    # default bf16-compute / f32-accumulate path: bf16-appropriate tolerance.
    out_bf16 = jax.block_until_ready(aspp_forward(x, params))
    assert out_bf16.shape == (N, C_out, H, W)
    err_bf16 = float(jnp.max(jnp.abs(out_bf16 - ref)))
    assert err_bf16 < 4e-2 * (1.0 + ref_scale), f"bf16 max abs err {err_bf16}"

    print("KERNEL_OK")
</pallas_src>

<mosaic_0001>
module attributes {stable_mosaic.version = 11 : i64} {
  func.func @_aspp_kernel(%arg0: i32, %arg1: memref<1x16x256xf32, #tpu.memory_space<vmem>>, %arg2: memref<32x16xf32, #tpu.memory_space<vmem>>, %arg3: memref<3x32x144xf32, #tpu.memory_space<vmem>>, %arg4: memref<4x32x1xf32, #tpu.memory_space<vmem>>, %arg5: memref<4x32x32xf32, #tpu.memory_space<vmem>>, %arg6: memref<1x32x1xf32, #tpu.memory_space<vmem>>, %arg7: memref<1x32x256xf32, #tpu.memory_space<vmem>>, %arg8: memref<144x256xf32, #tpu.memory_space<vmem>>, %arg9: memref<32x256xf32, #tpu.memory_space<vmem>>) attributes {dimension_semantics = [#tpu.dimension_semantics<parallel>], iteration_bounds = array<i64: 2>, scalar_prefetch = 0 : i64, scratch_operands = 2 : i64, tpu.core_type = #tpu.core_type<tc>, window_params = [{transform_indices = @transform_0, window_bounds = array<i64: 1, 16, 256>}, {pipeline_mode = #tpu.pipeline_mode<synchronous>, transform_indices = @transform_1, window_bounds = array<i64: 32, 16>}, {pipeline_mode = #tpu.pipeline_mode<synchronous>, transform_indices = @transform_2, window_bounds = array<i64: 3, 32, 144>}, {pipeline_mode = #tpu.pipeline_mode<synchronous>, transform_indices = @transform_3, window_bounds = array<i64: 4, 32, 1>}, {pipeline_mode = #tpu.pipeline_mode<synchronous>, transform_indices = @transform_4, window_bounds = array<i64: 4, 32, 32>}, {transform_indices = @transform_5, window_bounds = array<i64: 1, 32, 1>}, {transform_indices = @transform_6, window_bounds = array<i64: 1, 32, 256>}]} {
    %c0 = arith.constant 0 : index
    %c0_0 = arith.constant 0 : index
    %c0_1 = arith.constant 0 : index
    %0 = vector.load %arg1[%c0, %c0_0, %c0_1] : memref<1x16x256xf32, #tpu.memory_space<vmem>>, vector<1x16x256xf32>
    %1 = vector.shape_cast %0 : vector<1x16x256xf32> to vector<16x256xf32>
    %2 = tpu.iota {dimensions = array<i32: 1>} : vector<1x256xi32>
    %c16_i32 = arith.constant 16 : i32
    %c0_i32 = arith.constant 0 : i32
    %3 = arith.cmpi eq, %c16_i32, %c0_i32 : i32
    %c1_i32 = arith.constant 1 : i32
    %4 = arith.select %3, %c1_i32, %c16_i32 : i32
    %5 = vector.broadcast %4 : i32 to vector<1x256xi32>
    %6 = arith.remsi %2, %5 : vector<1x256xi32>
    %c0_i32_2 = arith.constant 0 : i32
    %7 = vector.broadcast %c0_i32_2 : i32 to vector<1x256xi32>
    %8 = arith.cmpi ne, %6, %7 : vector<1x256xi32>
    %c0_i32_3 = arith.constant 0 : i32
    %9 = vector.broadcast %c0_i32_3 : i32 to vector<1x256xi32>
    %10 = arith.cmpi slt, %6, %9 : vector<1x256xi32>
    %c0_i32_4 = arith.constant 0 : i32
    %11 = arith.cmpi slt, %4, %c0_i32_4 : i32
    %12 = vector.broadcast %11 : i1 to vector<1x256xi1>
    %13 = vector.broadcast %12 : vector<1x256xi1> to vector<1x256xi1>
    %14 = arith.xori %10, %13 : vector<1x256xi1>
    %15 = arith.andi %14, %8 : vector<1x256xi1>
    %16 = vector.broadcast %4 : i32 to vector<1x256xi32>
    %17 = arith.addi %6, %16 : vector<1x256xi32>
    %18 = arith.select %15, %17, %6 : vector<1x256xi1>, vector<1x256xi32>
    %c0_5 = arith.constant 0 : index
    %c0_6 = arith.constant 0 : index
    %19 = vector.load %arg2[%c0_5, %c0_6] : memref<32x16xf32, #tpu.memory_space<vmem>>, vector<32x16xf32>
    %cst = arith.constant dense<0.000000e+00> : vector<32x256xf32>
    %20 = tpu.matmul %19, %1, %cst {dimension_numbers = #tpu.dot_dimension_numbers<[1], [0], [0], [1], [0, 0, 1, 1], [], []>} : vector<32x16xf32>, vector<16x256xf32>, vector<32x256xf32> -> vector<32x256xf32>
    %c0_7 = arith.constant 0 : index
    %c0_8 = arith.constant 0 : index
    %c0_9 = arith.constant 0 : index
    %21 = vector.load %arg4[%c0_7, %c0_8, %c0_9] : memref<4x32x1xf32, #tpu.memory_space<vmem>>, vector<1x32x1xf32>
    %22 = vector.shape_cast %21 : vector<1x32x1xf32> to vector<32x1xf32>
    %23 = vector.broadcast %22 : vector<32x1xf32> to vector<32x256xf32>
    %24 = arith.addf %20, %23 : vector<32x256xf32>
    %cst_10 = arith.constant 0.000000e+00 : f32
    %25 = vector.broadcast %cst_10 : f32 to vector<32x256xf32>
    %26 = arith.maximumf %24, %25 : vector<32x256xf32>
    %c0_11 = arith.constant 0 : index
    %c0_12 = arith.constant 0 : index
    %c0_13 = arith.constant 0 : index
    %27 = vector.load %arg5[%c0_11, %c0_12, %c0_13] : memref<4x32x32xf32, #tpu.memory_space<vmem>>, vector<1x32x32xf32>
    %28 = vector.shape_cast %27 : vector<1x32x32xf32> to vector<32x32xf32>
    %cst_14 = arith.constant dense<0.000000e+00> : vector<32x256xf32>
    %29 = tpu.matmul %28, %26, %cst_14 {dimension_numbers = #tpu.dot_dimension_numbers<[1], [0], [0], [1], [0, 0, 1, 1], [], []>} : vector<32x32xf32>, vector<32x256xf32>, vector<32x256xf32> -> vector<32x256xf32>
    %c0_15 = arith.constant 0 : index
    %c0_16 = arith.constant 0 : index
    %c0_17 = arith.constant 0 : index
    %30 = vector.load %arg6[%c0_15, %c0_16, %c0_17] : memref<1x32x1xf32, #tpu.memory_space<vmem>>, vector<1x32x1xf32>
    %31 = vector.shape_cast %30 : vector<1x32x1xf32> to vector<32x1xf32>
    %32 = vector.broadcast %31 : vector<32x1xf32> to vector<32x256xf32>
    %33 = arith.addf %29, %32 : vector<32x256xf32>
    %c0_18 = arith.constant 0 : index
    %c0_19 = arith.constant 0 : index
    %34 = vector.load %arg9[%c0_18, %c0_19] : memref<32x256xf32, #tpu.memory_space<vmem>>, vector<32x256xf32>
    tpu.vector_store %arg9[%c0_18, %c0_19], %33 {strides = array<i32>} : memref<32x256xf32, #tpu.memory_space<vmem>>, vector<32x256xf32>,
    %c102_i32 = arith.constant 102 : i32
    %35 = tpu.dynamic_rotate %1 by %c102_i32 dim 1 : vector<16x256xf32>, i32 -> vector<16x256xf32>
    %c-6_i32 = arith.constant -6 : i32
    %36 = vector.broadcast %c-6_i32 : i32 to vector<1x256xi32>
    %37 = arith.addi %18, %36 : vector<1x256xi32>
    %c0_i32_20 = arith.constant 0 : i32
    %38 = vector.broadcast %c0_i32_20 : i32 to vector<1x256xi32>
    %39 = arith.cmpi sge, %37, %38 : vector<1x256xi32>
    %c-6_i32_21 = arith.constant -6 : i32
    %40 = vector.broadcast %c-6_i32_21 : i32 to vector<1x256xi32>
    %41 = arith.addi %18, %40 : vector<1x256xi32>
    %c16_i32_22 = arith.constant 16 : i32
    %42 = vector.broadcast %c16_i32_22 : i32 to vector<1x256xi32>
    %43 = arith.cmpi slt, %41, %42 : vector<1x256xi32>
    %44 = arith.andi %39, %43 : vector<1x256xi1>
    %c-102_i32 = arith.constant -102 : i32
    %45 = vector.broadcast %c-102_i32 : i32 to vector<1x256xi32>
    %46 = arith.addi %2, %45 : vector<1x256xi32>
    %c0_i32_23 = arith.constant 0 : i32
    %47 = vector.broadcast %c0_i32_23 : i32 to vector<1x256xi32>
    %48 = arith.cmpi sge, %46, %47 : vector<1x256xi32>
    %c-102_i32_24 = arith.constant -102 : i32
    %49 = vector.broadcast %c-102_i32_24 : i32 to vector<1x256xi32>
    %50 = arith.addi %2, %49 : vector<1x256xi32>
    %c256_i32 = arith.constant 256 : i32
    %51 = vector.broadcast %c256_i32 : i32 to vector<1x256xi32>
    %52 = arith.cmpi slt, %50, %51 : vector<1x256xi32>
    %53 = arith.andi %48, %52 : vector<1x256xi1>
    %54 = arith.andi %44, %53 : vector<1x256xi1>
    %cst_25 = arith.constant 0.000000e+00 : f32
    %55 = vector.broadcast %cst_25 : f32 to vector<16x256xf32>
    %56 = vector.shape_cast %54 : vector<1x256xi1> to vector<1x256xi1>
    %57 = vector.broadcast %56 : vector<1x256xi1> to vector<16x256xi1>
    %58 = arith.select %57, %35, %55 : vector<16x256xi1>, vector<16x256xf32>
    %c0_26 = arith.constant 0 : index
    %c0_27 = arith.constant 0 : index
    %59 = vector.load %arg8[%c0_26, %c0_27] : memref<144x256xf32, #tpu.memory_space<vmem>>, vector<16x256xf32>
    tpu.vector_store %arg8[%c0_26, %c0_27], %58 {strides = array<i32>} : memref<144x256xf32, #tpu.memory_space<vmem>>, vector<16x256xf32>,
    %c96_i32 = arith.constant 96 : i32
    %60 = tpu.dynamic_rotate %1 by %c96_i32 dim 1 : vector<16x256xf32>, i32 -> vector<16x256xf32>
    %c-96_i32 = arith.constant -96 : i32
    %61 = vector.broadcast %c-96_i32 : i32 to vector<1x256xi32>
    %62 = arith.addi %2, %61 : vector<1x256xi32>
    %c0_i32_28 = arith.constant 0 : i32
    %63 = vector.broadcast %c0_i32_28 : i32 to vector<1x256xi32>
    %64 = arith.cmpi sge, %62, %63 : vector<1x256xi32>
    %c-96_i32_29 = arith.constant -96 : i32
    %65 = vector.broadcast %c-96_i32_29 : i32 to vector<1x256xi32>
    %66 = arith.addi %2, %65 : vector<1x256xi32>
    %c256_i32_30 = arith.constant 256 : i32
    %67 = vector.broadcast %c256_i32_30 : i32 to vector<1x256xi32>
    %68 = arith.cmpi slt, %66, %67 : vector<1x256xi32>
    %69 = arith.andi %64, %68 : vector<1x256xi1>
    %cst_31 = arith.constant 0.000000e+00 : f32
    %70 = vector.broadcast %cst_31 : f32 to vector<16x256xf32>
    %71 = vector.shape_cast %69 : vector<1x256xi1> to vector<1x256xi1>
    %72 = vector.broadcast %71 : vector<1x256xi1> to vector<16x256xi1>
    %73 = arith.select %72, %60, %70 : vector<16x256xi1>, vector<16x256xf32>
    %c16 = arith.constant 16 : index
    %c0_32 = arith.constant 0 : index
    %74 = vector.load %arg8[%c16, %c0_32] : memref<144x256xf32, #tpu.memory_space<vmem>>, vector<16x256xf32>
    tpu.vector_store %arg8[%c16, %c0_32], %73 {strides = array<i32>} : memref<144x256xf32, #tpu.memory_space<vmem>>, vector<16x256xf32>,
    %c90_i32 = arith.constant 90 : i32
    %75 = tpu.dynamic_rotate %1 by %c90_i32 dim 1 : vector<16x256xf32>, i32 -> vector<16x256xf32>
    %c6_i32 = arith.constant 6 : i32
    %76 = vector.broadcast %c6_i32 : i32 to vector<1x256xi32>
    %77 = arith.addi %18, %76 : vector<1x256xi32>
    %c0_i32_33 = arith.constant 0 : i32
    %78 = vector.broadcast %c0_i32_33 : i32 to vector<1x256xi32>
    %79 = arith.cmpi sge, %77, %78 : vector<1x256xi32>
    %c6_i32_34 = arith.constant 6 : i32
    %80 = vector.broadcast %c6_i32_34 : i32 to vector<1x256xi32>
    %81 = arith.addi %18, %80 : vector<1x256xi32>
    %c16_i32_35 = arith.constant 16 : i32
    %82 = vector.broadcast %c16_i32_35 : i32 to vector<1x256xi32>
    %83 = arith.cmpi slt, %81, %82 : vector<1x256xi32>
    %84 = arith.andi %79, %83 : vector<1x256xi1>
    %c-90_i32 = arith.constant -90 : i32
    %85 = vector.broadcast %c-90_i32 : i32 to vector<1x256xi32>
    %86 = arith.addi %2, %85 : vector<1x256xi32>
    %c0_i32_36 = arith.constant 0 : i32
    %87 = vector.broadcast %c0_i32_36 : i32 to vector<1x256xi32>
    %88 = arith.cmpi sge, %86, %87 : vector<1x256xi32>
    %c-90_i32_37 = arith.constant -90 : i32
    %89 = vector.broadcast %c-90_i32_37 : i32 to vector<1x256xi32>
    %90 = arith.addi %2, %89 : vector<1x256xi32>
    %c256_i32_38 = arith.constant 256 : i32
    %91 = vector.broadcast %c256_i32_38 : i32 to vector<1x256xi32>
    %92 = arith.cmpi slt, %90, %91 : vector<1x256xi32>
    %93 = arith.andi %88, %92 : vector<1x256xi1>
    %94 = arith.andi %84, %93 : vector<1x256xi1>
    %cst_39 = arith.constant 0.000000e+00 : f32
    %95 = vector.broadcast %cst_39 : f32 to vector<16x256xf32>
    %96 = vector.shape_cast %94 : vector<1x256xi1> to vector<1x256xi1>
    %97 = vector.broadcast %96 : vector<1x256xi1> to vector<16x256xi1>
    %98 = arith.select %97, %75, %95 : vector<16x256xi1>, vector<16x256xf32>
    %c32 = arith.constant 32 : index
    %c0_40 = arith.constant 0 : index
    %99 = vector.load %arg8[%c32, %c0_40] : memref<144x256xf32, #tpu.memory_space<vmem>>, vector<16x256xf32>
    tpu.vector_store %arg8[%c32, %c0_40], %98 {strides = array<i32>} : memref<144x256xf32, #tpu.memory_space<vmem>>, vector<16x256xf32>,
    %c6_i32_41 = arith.constant 6 : i32
    %100 = tpu.dynamic_rotate %1 by %c6_i32_41 dim 1 : vector<16x256xf32>, i32 -> vector<16x256xf32>
    %c-6_i32_42 = arith.constant -6 : i32
    %101 = vector.broadcast %c-6_i32_42 : i32 to vector<1x256xi32>
    %102 = arith.addi %18, %101 : vector<1x256xi32>
    %c0_i32_43 = arith.constant 0 : i32
    %103 = vector.broadcast %c0_i32_43 : i32 to vector<1x256xi32>
    %104 = arith.cmpi sge, %102, %103 : vector<1x256xi32>
    %c-6_i32_44 = arith.constant -6 : i32
    %105 = vector.broadcast %c-6_i32_44 : i32 to vector<1x256xi32>
    %106 = arith.addi %18, %105 : vector<1x256xi32>
    %c16_i32_45 = arith.constant 16 : i32
    %107 = vector.broadcast %c16_i32_45 : i32 to vector<1x256xi32>
    %108 = arith.cmpi slt, %106, %107 : vector<1x256xi32>
    %109 = arith.andi %104, %108 : vector<1x256xi1>
    %cst_46 = arith.constant 0.000000e+00 : f32
    %110 = vector.broadcast %cst_46 : f32 to vector<16x256xf32>
    %111 = vector.shape_cast %109 : vector<1x256xi1> to vector<1x256xi1>
    %112 = vector.broadcast %111 : vector<1x256xi1> to vector<16x256xi1>
    %113 = arith.select %112, %100, %110 : vector<16x256xi1>, vector<16x256xf32>
    %c48 = arith.constant 48 : index
    %c0_47 = arith.constant 0 : index
    %114 = vector.load %arg8[%c48, %c0_47] : memref<144x256xf32, #tpu.memory_space<vmem>>, vector<16x256xf32>
    tpu.vector_store %arg8[%c48, %c0_47], %113 {strides = array<i32>} : memref<144x256xf32, #tpu.memory_space<vmem>>, vector<16x256xf32>,
    %c64 = arith.constant 64 : index
    %c0_48 = arith.constant 0 : index
    %115 = vector.load %arg8[%c64, %c0_48] : memref<144x256xf32, #tpu.memory_space<vmem>>, vector<16x256xf32>
    tpu.vector_store %arg8[%c64, %c0_48], %1 {strides = array<i32>} : memref<144x256xf32, #tpu.memory_space<vmem>>, vector<16x256xf32>,
    %c250_i32 = arith.constant 250 : i32
    %116 = tpu.dynamic_rotate %1 by %c250_i32 dim 1 : vector<16x256xf32>, i32 -> vector<16x256xf32>
    %c6_i32_49 = arith.constant 6 : i32
    %117 = vector.broadcast %c6_i32_49 : i32 to vector<1x256xi32>
    %118 = arith.addi %18, %117 : vector<1x256xi32>
    %c0_i32_50 = arith.constant 0 : i32
    %119 = vector.broadcast %c0_i32_50 : i32 to vector<1x256xi32>
    %120 = arith.cmpi sge, %118, %119 : vector<1x256xi32>
    %c6_i32_51 = arith.constant 6 : i32
    %121 = vector.broadcast %c6_i32_51 : i32 to vector<1x256xi32>
    %122 = arith.addi %18, %121 : vector<1x256xi32>
    %c16_i32_52 = arith.constant 16 : i32
    %123 = vector.broadcast %c16_i32_52 : i32 to vector<1x256xi32>
    %124 = arith.cmpi slt, %122, %123 : vector<1x256xi32>
    %125 = arith.andi %120, %124 : vector<1x256xi1>
    %cst_53 = arith.constant 0.000000e+00 : f32
    %126 = vector.broadcast %cst_53 : f32 to vector<16x256xf32>
    %127 = vector.shape_cast %125 : vector<1x256xi1> to vector<1x256xi1>
    %128 = vector.broadcast %127 : vector<1x256xi1> to vector<16x256xi1>
    %129 = arith.select %128, %116, %126 : vector<16x256xi1>, vector<16x256xf32>
    %c80 = arith.constant 80 : index
    %c0_54 = arith.constant 0 : index
    %130 = vector.load %arg8[%c80, %c0_54] : memref<144x256xf32, #tpu.memory_space<vmem>>, vector<16x256xf32>
    tpu.vector_store %arg8[%c80, %c0_54], %129 {strides = array<i32>} : memref<144x256xf32, #tpu.memory_space<vmem>>, vector<16x256xf32>,
    %c166_i32 = arith.constant 166 : i32
    %131 = tpu.dynamic_rotate %1 by %c166_i32 dim 1 : vector<16x256xf32>, i32 -> vector<16x256xf32>
    %c-6_i32_55 = arith.constant -6 : i32
    %132 = vector.broadcast %c-6_i32_55 : i32 to vector<1x256xi32>
    %133 = arith.addi %18, %132 : vector<1x256xi32>
    %c0_i32_56 = arith.constant 0 : i32
    %134 = vector.broadcast %c0_i32_56 : i32 to vector<1x256xi32>
    %135 = arith.cmpi sge, %133, %134 : vector<1x256xi32>
    %c-6_i32_57 = arith.constant -6 : i32
    %136 = vector.broadcast %c-6_i32_57 : i32 to vector<1x256xi32>
    %137 = arith.addi %18, %136 : vector<1x256xi32>
    %c16_i32_58 = arith.constant 16 : i32
    %138 = vector.broadcast %c16_i32_58 : i32 to vector<1x256xi32>
    %139 = arith.cmpi slt, %137, %138 : vector<1x256xi32>
    %140 = arith.andi %135, %139 : vector<1x256xi1>
    %c90_i32_59 = arith.constant 90 : i32
    %141 = vector.broadcast %c90_i32_59 : i32 to vector<1x256xi32>
    %142 = arith.addi %2, %141 : vector<1x256xi32>
    %c0_i32_60 = arith.constant 0 : i32
    %143 = vector.broadcast %c0_i32_60 : i32 to vector<1x256xi32>
    %144 = arith.cmpi sge, %142, %143 : vector<1x256xi32>
    %c90_i32_61 = arith.constant 90 : i32
    %145 = vector.broadcast %c90_i32_61 : i32 to vector<1x256xi32>
    %146 = arith.addi %2, %145 : vector<1x256xi32>
    %c256_i32_62 = arith.constant 256 : i32
    %147 = vector.broadcast %c256_i32_62 : i32 to vector<1x256xi32>
    %148 = arith.cmpi slt, %146, %147 : vector<1x256xi32>
    %149 = arith.andi %144, %148 : vector<1x256xi1>
    %150 = arith.andi %140, %149 : vector<1x256xi1>
    %cst_63 = arith.constant 0.000000e+00 : f32
    %151 = vector.broadcast %cst_63 : f32 to vector<16x256xf32>
    %152 = vector.shape_cast %150 : vector<1x256xi1> to vector<1x256xi1>
    %153 = vector.broadcast %152 : vector<1x256xi1> to vector<16x256xi1>
    %154 = arith.select %153, %131, %151 : vector<16x256xi1>, vector<16x256xf32>
    %c96 = arith.constant 96 : index
    %c0_64 = arith.constant 0 : index
    %155 = vector.load %arg8[%c96, %c0_64] : memref<144x256xf32, #tpu.memory_space<vmem>>, vector<16x256xf32>
    tpu.vector_store %arg8[%c96, %c0_64], %154 {strides = array<i32>} : memref<144x256xf32, #tpu.memory_space<vmem>>, vector<16x256xf32>,
    %c160_i32 = arith.constant 160 : i32
    %156 = tpu.dynamic_rotate %1 by %c160_i32 dim 1 : vector<16x256xf32>, i32 -> vector<16x256xf32>
    %c96_i32_65 = arith.constant 96 : i32
    %157 = vector.broadcast %c96_i32_65 : i32 to vector<1x256xi32>
    %158 = arith.addi %2, %157 : vector<1x256xi32>
    %c0_i32_66 = arith.constant 0 : i32
    %159 = vector.broadcast %c0_i32_66 : i32 to vector<1x256xi32>
    %160 = arith.cmpi sge, %158, %159 : vector<1x256xi32>
    %c96_i32_67 = arith.constant 96 : i32
    %161 = vector.broadcast %c96_i32_67 : i32 to vector<1x256xi32>
    %162 = arith.addi %2, %161 : vector<1x256xi32>
    %c256_i32_68 = arith.constant 256 : i32
    %163 = vector.broadcast %c256_i32_68 : i32 to vector<1x256xi32>
    %164 = arith.cmpi slt, %162, %163 : vector<1x256xi32>
    %165 = arith.andi %160, %164 : vector<1x256xi1>
    %cst_69 = arith.constant 0.000000e+00 : f32
    %166 = vector.broadcast %cst_69 : f32 to vector<16x256xf32>
    %167 = vector.shape_cast %165 : vector<1x256xi1> to vector<1x256xi1>
    %168 = vector.broadcast %167 : vector<1x256xi1> to vector<16x256xi1>
    %169 = arith.select %168, %156, %166 : vector<16x256xi1>, vector<16x256xf32>
    %c112 = arith.constant 112 : index
    %c0_70 = arith.constant 0 : index
    %170 = vector.load %arg8[%c112, %c0_70] : memref<144x256xf32, #tpu.memory_space<vmem>>, vector<16x256xf32>
    tpu.vector_store %arg8[%c112, %c0_70], %169 {strides = array<i32>} : memref<144x256xf32, #tpu.memory_space<vmem>>, vector<16x256xf32>,
    %c154_i32 = arith.constant 154 : i32
    %171 = tpu.dynamic_rotate %1 by %c154_i32 dim 1 : vector<16x256xf32>, i32 -> vector<16x256xf32>
    %c6_i32_71 = arith.constant 6 : i32
    %172 = vector.broadcast %c6_i32_71 : i32 to vector<1x256xi32>
    %173 = arith.addi %18, %172 : vector<1x256xi32>
    %c0_i32_72 = arith.constant 0 : i32
    %174 = vector.broadcast %c0_i32_72 : i32 to vector<1x256xi32>
    %175 = arith.cmpi sge, %173, %174 : vector<1x256xi32>
    %c6_i32_73 = arith.constant 6 : i32
    %176 = vector.broadcast %c6_i32_73 : i32 to vector<1x256xi32>
    %177 = arith.addi %18, %176 : vector<1x256xi32>
    %c16_i32_74 = arith.constant 16 : i32
    %178 = vector.broadcast %c16_i32_74 : i32 to vector<1x256xi32>
    %179 = arith.cmpi slt, %177, %178 : vector<1x256xi32>
    %180 = arith.andi %175, %179 : vector<1x256xi1>
    %c102_i32_75 = arith.constant 102 : i32
    %181 = vector.broadcast %c102_i32_75 : i32 to vector<1x256xi32>
    %182 = arith.addi %2, %181 : vector<1x256xi32>
    %c0_i32_76 = arith.constant 0 : i32
    %183 = vector.broadcast %c0_i32_76 : i32 to vector<1x256xi32>
    %184 = arith.cmpi sge, %182, %183 : vector<1x256xi32>
    %c102_i32_77 = arith.constant 102 : i32
    %185 = vector.broadcast %c102_i32_77 : i32 to vector<1x256xi32>
    %186 = arith.addi %2, %185 : vector<1x256xi32>
    %c256_i32_78 = arith.constant 256 : i32
    %187 = vector.broadcast %c256_i32_78 : i32 to vector<1x256xi32>
    %188 = arith.cmpi slt, %186, %187 : vector<1x256xi32>
    %189 = arith.andi %184, %188 : vector<1x256xi1>
    %190 = arith.andi %180, %189 : vector<1x256xi1>
    %cst_79 = arith.constant 0.000000e+00 : f32
    %191 = vector.broadcast %cst_79 : f32 to vector<16x256xf32>
    %192 = vector.shape_cast %190 : vector<1x256xi1> to vector<1x256xi1>
    %193 = vector.broadcast %192 : vector<1x256xi1> to vector<16x256xi1>
    %194 = arith.select %193, %171, %191 : vector<16x256xi1>, vector<16x256xf32>
    %c128 = arith.constant 128 : index
    %c0_80 = arith.constant 0 : index
    %195 = vector.load %arg8[%c128, %c0_80] : memref<144x256xf32, #tpu.memory_space<vmem>>, vector<16x256xf32>
    tpu.vector_store %arg8[%c128, %c0_80], %194 {strides = array<i32>} : memref<144x256xf32, #tpu.memory_space<vmem>>, vector<16x256xf32>,
    %c0_81 = arith.constant 0 : index
    %c0_82 = arith.constant 0 : index
    %c0_83 = arith.constant 0 : index
    %196 = vector.load %arg3[%c0_81, %c0_82, %c0_83] : memref<3x32x144xf32, #tpu.memory_space<vmem>>, vector<1x32x144xf32>
    %197 = vector.shape_cast %196 : vector<1x32x144xf32> to vector<32x144xf32>
    %c0_84 = arith.constant 0 : index
    %c0_85 = arith.constant 0 : index
    %198 = vector.load %arg8[%c0_84, %c0_85] : memref<144x256xf32, #tpu.memory_space<vmem>>, vector<144x256xf32>
    %cst_86 = arith.constant dense<0.000000e+00> : vector<32x256xf32>
    %199 = tpu.matmul %197, %198, %cst_86 {dimension_numbers = #tpu.dot_dimension_numbers<[1], [0], [0], [1], [0, 0, 1, 1], [], []>} : vector<32x144xf32>, vector<144x256xf32>, vector<32x256xf32> -> vector<32x256xf32>
    %c1 = arith.constant 1 : index
    %c0_87 = arith.constant 0 : index
    %c0_88 = arith.constant 0 : index
    %200 = vector.load %arg4[%c1, %c0_87, %c0_88] : memref<4x32x1xf32, #tpu.memory_space<vmem>>, vector<1x32x1xf32>
    %201 = vector.shape_cast %200 : vector<1x32x1xf32> to vector<32x1xf32>
    %202 = vector.broadcast %201 : vector<32x1xf32> to vector<32x256xf32>
    %203 = arith.addf %199, %202 : vector<32x256xf32>
    %cst_89 = arith.constant 0.000000e+00 : f32
    %204 = vector.broadcast %cst_89 : f32 to vector<32x256xf32>
    %205 = arith.maximumf %203, %204 : vector<32x256xf32>
    %c0_90 = arith.constant 0 : index
    %c0_91 = arith.constant 0 : index
    %206 = vector.load %arg9[%c0_90, %c0_91] : memref<32x256xf32, #tpu.memory_space<vmem>>, vector<32x256xf32>
    %c1_92 = arith.constant 1 : index
    %c0_93 = arith.constant 0 : index
    %c0_94 = arith.constant 0 : index
    %207 = vector.load %arg5[%c1_92, %c0_93, %c0_94] : memref<4x32x32xf32, #tpu.memory_space<vmem>>, vector<1x32x32xf32>
    %208 = vector.shape_cast %207 : vector<1x32x32xf32> to vector<32x32xf32>
    %cst_95 = arith.constant dense<0.000000e+00> : vector<32x256xf32>
    %209 = tpu.matmul %208, %205, %cst_95 {dimension_numbers = #tpu.dot_dimension_numbers<[1], [0], [0], [1], [0, 0, 1, 1], [], []>} : vector<32x32xf32>, vector<32x256xf32>, vector<32x256xf32> -> vector<32x256xf32>
    %210 = arith.addf %206, %209 : vector<32x256xf32>
    %c0_96 = arith.constant 0 : index
    %c0_97 = arith.constant 0 : index
    %211 = vector.load %arg9[%c0_96, %c0_97] : memref<32x256xf32, #tpu.memory_space<vmem>>, vector<32x256xf32>
    tpu.vector_store %arg9[%c0_96, %c0_97], %210 {strides = array<i32>} : memref<32x256xf32, #tpu.memory_space<vmem>>, vector<32x256xf32>,
    %c204_i32 = arith.constant 204 : i32
    %212 = tpu.dynamic_rotate %1 by %c204_i32 dim 1 : vector<16x256xf32>, i32 -> vector<16x256xf32>
    %c-12_i32 = arith.constant -12 : i32
    %213 = vector.broadcast %c-12_i32 : i32 to vector<1x256xi32>
    %214 = arith.addi %18, %213 : vector<1x256xi32>
    %c0_i32_98 = arith.constant 0 : i32
    %215 = vector.broadcast %c0_i32_98 : i32 to vector<1x256xi32>
    %216 = arith.cmpi sge, %214, %215 : vector<1x256xi32>
    %c-12_i32_99 = arith.constant -12 : i32
    %217 = vector.broadcast %c-12_i32_99 : i32 to vector<1x256xi32>
    %218 = arith.addi %18, %217 : vector<1x256xi32>
    %c16_i32_100 = arith.constant 16 : i32
    %219 = vector.broadcast %c16_i32_100 : i32 to vector<1x256xi32>
    %220 = arith.cmpi slt, %218, %219 : vector<1x256xi32>
    %221 = arith.andi %216, %220 : vector<1x256xi1>
    %c-204_i32 = arith.constant -204 : i32
    %222 = vector.broadcast %c-204_i32 : i32 to vector<1x256xi32>
    %223 = arith.addi %2, %222 : vector<1x256xi32>
    %c0_i32_101 = arith.constant 0 : i32
    %224 = vector.broadcast %c0_i32_101 : i32 to vector<1x256xi32>
    %225 = arith.cmpi sge, %223, %224 : vector<1x256xi32>
    %c-204_i32_102 = arith.constant -204 : i32
    %226 = vector.broadcast %c-204_i32_102 : i32 to vector<1x256xi32>
    %227 = arith.addi %2, %226 : vector<1x256xi32>
    %c256_i32_103 = arith.constant 256 : i32
    %228 = vector.broadcast %c256_i32_103 : i32 to vector<1x256xi32>
    %229 = arith.cmpi slt, %227, %228 : vector<1x256xi32>
    %230 = arith.andi %225, %229 : vector<1x256xi1>
    %231 = arith.andi %221, %230 : vector<1x256xi1>
    %cst_104 = arith.constant 0.000000e+00 : f32
    %232 = vector.broadcast %cst_104 : f32 to vector<16x256xf32>
    %233 = vector.shape_cast %231 : vector<1x256xi1> to vector<1x256xi1>
    %234 = vector.broadcast %233 : vector<1x256xi1> to vector<16x256xi1>
    %235 = arith.select %234, %212, %232 : vector<16x256xi1>, vector<16x256xf32>
    %c0_105 = arith.constant 0 : index
    %c0_106 = arith.constant 0 : index
    %236 = vector.load %arg8[%c0_105, %c0_106] : memref<144x256xf32, #tpu.memory_space<vmem>>, vector<16x256xf32>
    tpu.vector_store %arg8[%c0_105, %c0_106], %235 {strides = array<i32>} : memref<144x256xf32, #tpu.memory_space<vmem>>, vector<16x256xf32>,
    %c192_i32 = arith.constant 192 : i32
    %237 = tpu.dynamic_rotate %1 by %c192_i32 dim 1 : vector<16x256xf32>, i32 -> vector<16x256xf32>
    %c-192_i32 = arith.constant -192 : i32
    %238 = vector.broadcast %c-192_i32 : i32 to vector<1x256xi32>
    %239 = arith.addi %2, %238 : vector<1x256xi32>
    %c0_i32_107 = arith.constant 0 : i32
    %240 = vector.broadcast %c0_i32_107 : i32 to vector<1x256xi32>
    %241 = arith.cmpi sge, %239, %240 : vector<1x256xi32>
    %c-192_i32_108 = arith.constant -192 : i32
    %242 = vector.broadcast %c-192_i32_108 : i32 to vector<1x256xi32>
    %243 = arith.addi %2, %242 : vector<1x256xi32>
    %c256_i32_109 = arith.constant 256 : i32
    %244 = vector.broadcast %c256_i32_109 : i32 to vector<1x256xi32>
    %245 = arith.cmpi slt, %243, %244 : vector<1x256xi32>
    %246 = arith.andi %241, %245 : vector<1x256xi1>
    %cst_110 = arith.constant 0.000000e+00 : f32
    %247 = vector.broadcast %cst_110 : f32 to vector<16x256xf32>
    %248 = vector.shape_cast %246 : vector<1x256xi1> to vector<1x256xi1>
    %249 = vector.broadcast %248 : vector<1x256xi1> to vector<16x256xi1>
    %250 = arith.select %249, %237, %247 : vector<16x256xi1>, vector<16x256xf32>
    %c16_111 = arith.constant 16 : index
    %c0_112 = arith.constant 0 : index
    %251 = vector.load %arg8[%c16_111, %c0_112] : memref<144x256xf32, #tpu.memory_space<vmem>>, vector<16x256xf32>
    tpu.vector_store %arg8[%c16_111, %c0_112], %250 {strides = array<i32>} : memref<144x256xf32, #tpu.memory_space<vmem>>, vector<16x256xf32>,
    %c180_i32 = arith.constant 180 : i32
    %252 = tpu.dynamic_rotate %1 by %c180_i32 dim 1 : vector<16x256xf32>, i32 -> vector<16x256xf32>
    %c12_i32 = arith.constant 12 : i32
    %253 = vector.broadcast %c12_i32 : i32 to vector<1x256xi32>
    %254 = arith.addi %18, %253 : vector<1x256xi32>
    %c0_i32_113 = arith.constant 0 : i32
    %255 = vector.broadcast %c0_i32_113 : i32 to vector<1x256xi32>
    %256 = arith.cmpi sge, %254, %255 : vector<1x256xi32>
    %c12_i32_114 = arith.constant 12 : i32
    %257 = vector.broadcast %c12_i32_114 : i32 to vector<1x256xi32>
    %258 = arith.addi %18, %257 : vector<1x256xi32>
    %c16_i32_115 = arith.constant 16 : i32
    %259 = vector.broadcast %c16_i32_115 : i32 to vector<1x256xi32>
    %260 = arith.cmpi slt, %258, %259 : vector<1x256xi32>
    %261 = arith.andi %256, %260 : vector<1x256xi1>
    %c-180_i32 = arith.constant -180 : i32
    %262 = vector.broadcast %c-180_i32 : i32 to vector<1x256xi32>
    %263 = arith.addi %2, %262 : vector<1x256xi32>
    %c0_i32_116 = arith.constant 0 : i32
    %264 = vector.broadcast %c0_i32_116 : i32 to vector<1x256xi32>
    %265 = arith.cmpi sge, %263, %264 : vector<1x256xi32>
    %c-180_i32_117 = arith.constant -180 : i32
    %266 = vector.broadcast %c-180_i32_117 : i32 to vector<1x256xi32>
    %267 = arith.addi %2, %266 : vector<1x256xi32>
    %c256_i32_118 = arith.constant 256 : i32
    %268 = vector.broadcast %c256_i32_118 : i32 to vector<1x256xi32>
    %269 = arith.cmpi slt, %267, %268 : vector<1x256xi32>
    %270 = arith.andi %265, %269 : vector<1x256xi1>
    %271 = arith.andi %261, %270 : vector<1x256xi1>
    %cst_119 = arith.constant 0.000000e+00 : f32
    %272 = vector.broadcast %cst_119 : f32 to vector<16x256xf32>
    %273 = vector.shape_cast %271 : vector<1x256xi1> to vector<1x256xi1>
    %274 = vector.broadcast %273 : vector<1x256xi1> to vector<16x256xi1>
    %275 = arith.select %274, %252, %272 : vector<16x256xi1>, vector<16x256xf32>
    %c32_120 = arith.constant 32 : index
    %c0_121 = arith.constant 0 : index
    %276 = vector.load %arg8[%c32_120, %c0_121] : memref<144x256xf32, #tpu.memory_space<vmem>>, vector<16x256xf32>
    tpu.vector_store %arg8[%c32_120, %c0_121], %275 {strides = array<i32>} : memref<144x256xf32, #tpu.memory_space<vmem>>, vector<16x256xf32>,
    %c12_i32_122 = arith.constant 12 : i32
    %277 = tpu.dynamic_rotate %1 by %c12_i32_122 dim 1 : vector<16x256xf32>, i32 -> vector<16x256xf32>
    %c-12_i32_123 = arith.constant -12 : i32
    %278 = vector.broadcast %c-12_i32_123 : i32 to vector<1x256xi32>
    %279 = arith.addi %18, %278 : vector<1x256xi32>
    %c0_i32_124 = arith.constant 0 : i32
    %280 = vector.broadcast %c0_i32_124 : i32 to vector<1x256xi32>
    %281 = arith.cmpi sge, %279, %280 : vector<1x256xi32>
    %c-12_i32_125 = arith.constant -12 : i32
    %282 = vector.broadcast %c-12_i32_125 : i32 to vector<1x256xi32>
    %283 = arith.addi %18, %282 : vector<1x256xi32>
    %c16_i32_126 = arith.constant 16 : i32
    %284 = vector.broadcast %c16_i32_126 : i32 to vector<1x256xi32>
    %285 = arith.cmpi slt, %283, %284 : vector<1x256xi32>
    %286 = arith.andi %281, %285 : vector<1x256xi1>
    %cst_127 = arith.constant 0.000000e+00 : f32
    %287 = vector.broadcast %cst_127 : f32 to vector<16x256xf32>
    %288 = vector.shape_cast %286 : vector<1x256xi1> to vector<1x256xi1>
    %289 = vector.broadcast %288 : vector<1x256xi1> to vector<16x256xi1>
    %290 = arith.select %289, %277, %287 : vector<16x256xi1>, vector<16x256xf32>
    %c48_128 = arith.constant 48 : index
    %c0_129 = arith.constant 0 : index
    %291 = vector.load %arg8[%c48_128, %c0_129] : memref<144x256xf32, #tpu.memory_space<vmem>>, vector<16x256xf32>
    tpu.vector_store %arg8[%c48_128, %c0_129], %290 {strides = array<i32>} : memref<144x256xf32, #tpu.memory_space<vmem>>, vector<16x256xf32>,
    %c64_130 = arith.constant 64 : index
    %c0_131 = arith.constant 0 : index
    %292 = vector.load %arg8[%c64_130, %c0_131] : memref<144x256xf32, #tpu.memory_space<vmem>>, vector<16x256xf32>
    tpu.vector_store %arg8[%c64_130, %c0_131], %1 {strides = array<i32>} : memref<144x256xf32, #tpu.memory_space<vmem>>, vector<16x256xf32>,
    %c244_i32 = arith.constant 244 : i32
    %293 = tpu.dynamic_rotate %1 by %c244_i32 dim 1 : vector<16x256xf32>, i32 -> vector<16x256xf32>
    %c12_i32_132 = arith.constant 12 : i32
    %294 = vector.broadcast %c12_i32_132 : i32 to vector<1x256xi32>
    %295 = arith.addi %18, %294 : vector<1x256xi32>
    %c0_i32_133 = arith.constant 0 : i32
    %296 = vector.broadcast %c0_i32_133 : i32 to vector<1x256xi32>
    %297 = arith.cmpi sge, %295, %296 : vector<1x256xi32>
    %c12_i32_134 = arith.constant 12 : i32
    %298 = vector.broadcast %c12_i32_134 : i32 to vector<1x256xi32>
    %299 = arith.addi %18, %298 : vector<1x256xi32>
    %c16_i32_135 = arith.constant 16 : i32
    %300 = vector.broadcast %c16_i32_135 : i32 to vector<1x256xi32>
    %301 = arith.cmpi slt, %299, %300 : vector<1x256xi32>
    %302 = arith.andi %297, %301 : vector<1x256xi1>
    %cst_136 = arith.constant 0.000000e+00 : f32
    %303 = vector.broadcast %cst_136 : f32 to vector<16x256xf32>
    %304 = vector.shape_cast %302 : vector<1x256xi1> to vector<1x256xi1>
    %305 = vector.broadcast %304 : vector<1x256xi1> to vector<16x256xi1>
    %306 = arith.select %305, %293, %303 : vector<16x256xi1>, vector<16x256xf32>
    %c80_137 = arith.constant 80 : index
    %c0_138 = arith.constant 0 : index
    %307 = vector.load %arg8[%c80_137, %c0_138] : memref<144x256xf32, #tpu.memory_space<vmem>>, vector<16x256xf32>
    tpu.vector_store %arg8[%c80_137, %c0_138], %306 {strides = array<i32>} : memref<144x256xf32, #tpu.memory_space<vmem>>, vector<16x256xf32>,
    %c76_i32 = arith.constant 76 : i32
    %308 = tpu.dynamic_rotate %1 by %c76_i32 dim 1 : vector<16x256xf32>, i32 -> vector<16x256xf32>
    %c-12_i32_139 = arith.constant -12 : i32
    %309 = vector.broadcast %c-12_i32_139 : i32 to vector<1x256xi32>
    %310 = arith.addi %18, %309 : vector<1x256xi32>
    %c0_i32_140 = arith.constant 0 : i32
    %311 = vector.broadcast %c0_i32_140 : i32 to vector<1x256xi32>
    %312 = arith.cmpi sge, %310, %311 : vector<1x256xi32>
    %c-12_i32_141 = arith.constant -12 : i32
    %313 = vector.broadcast %c-12_i32_141 : i32 to vector<1x256xi32>
    %314 = arith.addi %18, %313 : vector<1x256xi32>
    %c16_i32_142 = arith.constant 16 : i32
    %315 = vector.broadcast %c16_i32_142 : i32 to vector<1x256xi32>
    %316 = arith.cmpi slt, %314, %315 : vector<1x256xi32>
    %317 = arith.andi %312, %316 : vector<1x256xi1>
    %c180_i32_143 = arith.constant 180 : i32
    %318 = vector.broadcast %c180_i32_143 : i32 to vector<1x256xi32>
    %319 = arith.addi %2, %318 : vector<1x256xi32>
    %c0_i32_144 = arith.constant 0 : i32
    %320 = vector.broadcast %c0_i32_144 : i32 to vector<1x256xi32>
    %321 = arith.cmpi sge, %319, %320 : vector<1x256xi32>
    %c180_i32_145 = arith.constant 180 : i32
    %322 = vector.broadcast %c180_i32_145 : i32 to vector<1x256xi32>
    %323 = arith.addi %2, %322 : vector<1x256xi32>
    %c256_i32_146 = arith.constant 256 : i32
    %324 = vector.broadcast %c256_i32_146 : i32 to vector<1x256xi32>
    %325 = arith.cmpi slt, %323, %324 : vector<1x256xi32>
    %326 = arith.andi %321, %325 : vector<1x256xi1>
    %327 = arith.andi %317, %326 : vector<1x256xi1>
    %cst_147 = arith.constant 0.000000e+00 : f32
    %328 = vector.broadcast %cst_147 : f32 to vector<16x256xf32>
    %329 = vector.shape_cast %327 : vector<1x256xi1> to vector<1x256xi1>
    %330 = vector.broadcast %329 : vector<1x256xi1> to vector<16x256xi1>
    %331 = arith.select %330, %308, %328 : vector<16x256xi1>, vector<16x256xf32>
    %c96_148 = arith.constant 96 : index
    %c0_149 = arith.constant 0 : index
    %332 = vector.load %arg8[%c96_148, %c0_149] : memref<144x256xf32, #tpu.memory_space<vmem>>, vector<16x256xf32>
    tpu.vector_store %arg8[%c96_148, %c0_149], %331 {strides = array<i32>} : memref<144x256xf32, #tpu.memory_space<vmem>>, vector<16x256xf32>,
    %c64_i32 = arith.constant 64 : i32
    %333 = tpu.dynamic_rotate %1 by %c64_i32 dim 1 : vector<16x256xf32>, i32 -> vector<16x256xf32>
    %c192_i32_150 = arith.constant 192 : i32
    %334 = vector.broadcast %c192_i32_150 : i32 to vector<1x256xi32>
    %335 = arith.addi %2, %334 : vector<1x256xi32>
    %c0_i32_151 = arith.constant 0 : i32
    %336 = vector.broadcast %c0_i32_151 : i32 to vector<1x256xi32>
    %337 = arith.cmpi sge, %335, %336 : vector<1x256xi32>
    %c192_i32_152 = arith.constant 192 : i32
    %338 = vector.broadcast %c192_i32_152 : i32 to vector<1x256xi32>
    %339 = arith.addi %2, %338 : vector<1x256xi32>
    %c256_i32_153 = arith.constant 256 : i32
    %340 = vector.broadcast %c256_i32_153 : i32 to vector<1x256xi32>
    %341 = arith.cmpi slt, %339, %340 : vector<1x256xi32>
    %342 = arith.andi %337, %341 : vector<1x256xi1>
    %cst_154 = arith.constant 0.000000e+00 : f32
    %343 = vector.broadcast %cst_154 : f32 to vector<16x256xf32>
    %344 = vector.shape_cast %342 : vector<1x256xi1> to vector<1x256xi1>
    %345 = vector.broadcast %344 : vector<1x256xi1> to vector<16x256xi1>
    %346 = arith.select %345, %333, %343 : vector<16x256xi1>, vector<16x256xf32>
    %c112_155 = arith.constant 112 : index
    %c0_156 = arith.constant 0 : index
    %347 = vector.load %arg8[%c112_155, %c0_156] : memref<144x256xf32, #tpu.memory_space<vmem>>, vector<16x256xf32>
    tpu.vector_store %arg8[%c112_155, %c0_156], %346 {strides = array<i32>} : memref<144x256xf32, #tpu.memory_space<vmem>>, vector<16x256xf32>,
    %c52_i32 = arith.constant 52 : i32
    %348 = tpu.dynamic_rotate %1 by %c52_i32 dim 1 : vector<16x256xf32>, i32 -> vector<16x256xf32>
    %c12_i32_157 = arith.constant 12 : i32
    %349 = vector.broadcast %c12_i32_157 : i32 to vector<1x256xi32>
    %350 = arith.addi %18, %349 : vector<1x256xi32>
    %c0_i32_158 = arith.constant 0 : i32
    %351 = vector.broadcast %c0_i32_158 : i32 to vector<1x256xi32>
    %352 = arith.cmpi sge, %350, %351 : vector<1x256xi32>
    %c12_i32_159 = arith.constant 12 : i32
    %353 = vector.broadcast %c12_i32_159 : i32 to vector<1x256xi32>
    %354 = arith.addi %18, %353 : vector<1x256xi32>
    %c16_i32_160 = arith.constant 16 : i32
    %355 = vector.broadcast %c16_i32_160 : i32 to vector<1x256xi32>
    %356 = arith.cmpi slt, %354, %355 : vector<1x256xi32>
    %357 = arith.andi %352, %356 : vector<1x256xi1>
    %c204_i32_161 = arith.constant 204 : i32
    %358 = vector.broadcast %c204_i32_161 : i32 to vector<1x256xi32>
    %359 = arith.addi %2, %358 : vector<1x256xi32>
    %c0_i32_162 = arith.constant 0 : i32
    %360 = vector.broadcast %c0_i32_162 : i32 to vector<1x256xi32>
    %361 = arith.cmpi sge, %359, %360 : vector<1x256xi32>
    %c204_i32_163 = arith.constant 204 : i32
    %362 = vector.broadcast %c204_i32_163 : i32 to vector<1x256xi32>
    %363 = arith.addi %2, %362 : vector<1x256xi32>
    %c256_i32_164 = arith.constant 256 : i32
    %364 = vector.broadcast %c256_i32_164 : i32 to vector<1x256xi32>
    %365 = arith.cmpi slt, %363, %364 : vector<1x256xi32>
    %366 = arith.andi %361, %365 : vector<1x256xi1>
    %367 = arith.andi %357, %366 : vector<1x256xi1>
    %cst_165 = arith.constant 0.000000e+00 : f32
    %368 = vector.broadcast %cst_165 : f32 to vector<16x256xf32>
    %369 = vector.shape_cast %367 : vector<1x256xi1> to vector<1x256xi1>
    %370 = vector.broadcast %369 : vector<1x256xi1> to vector<16x256xi1>
    %371 = arith.select %370, %348, %368 : vector<16x256xi1>, vector<16x256xf32>
    %c128_166 = arith.constant 128 : index
    %c0_167 = arith.constant 0 : index
    %372 = vector.load %arg8[%c128_166, %c0_167] : memref<144x256xf32, #tpu.memory_space<vmem>>, vector<16x256xf32>
    tpu.vector_store %arg8[%c128_166, %c0_167], %371 {strides = array<i32>} : memref<144x256xf32, #tpu.memory_space<vmem>>, vector<16x256xf32>,
    %c1_168 = arith.constant 1 : index
    %c0_169 = arith.constant 0 : index
    %c0_170 = arith.constant 0 : index
    %373 = vector.load %arg3[%c1_168, %c0_169, %c0_170] : memref<3x32x144xf32, #tpu.memory_space<vmem>>, vector<1x32x144xf32>
    %374 = vector.shape_cast %373 : vector<1x32x144xf32> to vector<32x144xf32>
    %c0_171 = arith.constant 0 : index
    %c0_172 = arith.constant 0 : index
    %375 = vector.load %arg8[%c0_171, %c0_172] : memref<144x256xf32, #tpu.memory_space<vmem>>, vector<144x256xf32>
    %cst_173 = arith.constant dense<0.000000e+00> : vector<32x256xf32>
    %376 = tpu.matmul %374, %375, %cst_173 {dimension_numbers = #tpu.dot_dimension_numbers<[1], [0], [0], [1], [0, 0, 1, 1], [], []>} : vector<32x144xf32>, vector<144x256xf32>, vector<32x256xf32> -> vector<32x256xf32>
    %c2 = arith.constant 2 : index
    %c0_174 = arith.constant 0 : index
    %c0_175 = arith.constant 0 : index
    %377 = vector.load %arg4[%c2, %c0_174, %c0_175] : memref<4x32x1xf32, #tpu.memory_space<vmem>>, vector<1x32x1xf32>
    %378 = vector.shape_cast %377 : vector<1x32x1xf32> to vector<32x1xf32>
    %379 = vector.broadcast %378 : vector<32x1xf32> to vector<32x256xf32>
    %380 = arith.addf %376, %379 : vector<32x256xf32>
    %cst_176 = arith.constant 0.000000e+00 : f32
    %381 = vector.broadcast %cst_176 : f32 to vector<32x256xf32>
    %382 = arith.maximumf %380, %381 : vector<32x256xf32>
    %c0_177 = arith.constant 0 : index
    %c0_178 = arith.constant 0 : index
    %383 = vector.load %arg9[%c0_177, %c0_178] : memref<32x256xf32, #tpu.memory_space<vmem>>, vector<32x256xf32>
    %c2_179 = arith.constant 2 : index
    %c0_180 = arith.constant 0 : index
    %c0_181 = arith.constant 0 : index
    %384 = vector.load %arg5[%c2_179, %c0_180, %c0_181] : memref<4x32x32xf32, #tpu.memory_space<vmem>>, vector<1x32x32xf32>
    %385 = vector.shape_cast %384 : vector<1x32x32xf32> to vector<32x32xf32>
    %cst_182 = arith.constant dense<0.000000e+00> : vector<32x256xf32>
    %386 = tpu.matmul %385, %382, %cst_182 {dimension_numbers = #tpu.dot_dimension_numbers<[1], [0], [0], [1], [0, 0, 1, 1], [], []>} : vector<32x32xf32>, vector<32x256xf32>, vector<32x256xf32> -> vector<32x256xf32>
    %387 = arith.addf %383, %386 : vector<32x256xf32>
    %c0_183 = arith.constant 0 : index
    %c0_184 = arith.constant 0 : index
    %388 = vector.load %arg9[%c0_183, %c0_184] : memref<32x256xf32, #tpu.memory_space<vmem>>, vector<32x256xf32>
    tpu.vector_store %arg9[%c0_183, %c0_184], %387 {strides = array<i32>} : memref<32x256xf32, #tpu.memory_space<vmem>>, vector<32x256xf32>,
    %cst_185 = arith.constant 0.000000e+00 : f32
    %389 = vector.broadcast %cst_185 : f32 to vector<16x256xf32>
    %c0_186 = arith.constant 0 : index
    %c0_187 = arith.constant 0 : index
    %390 = vector.load %arg8[%c0_186, %c0_187] : memref<144x256xf32, #tpu.memory_space<vmem>>, vector<16x256xf32>
    tpu.vector_store %arg8[%c0_186, %c0_187], %389 {strides = array<i32>} : memref<144x256xf32, #tpu.memory_space<vmem>>, vector<16x256xf32>,
    %cst_188 = arith.constant 0.000000e+00 : f32
    %391 = vector.broadcast %cst_188 : f32 to vector<16x256xf32>
    %c16_189 = arith.constant 16 : index
    %c0_190 = arith.constant 0 : index
    %392 = vector.load %arg8[%c16_189, %c0_190] : memref<144x256xf32, #tpu.memory_space<vmem>>, vector<16x256xf32>
    tpu.vector_store %arg8[%c16_189, %c0_190], %391 {strides = array<i32>} : memref<144x256xf32, #tpu.memory_space<vmem>>, vector<16x256xf32>,
    %cst_191 = arith.constant 0.000000e+00 : f32
    %393 = vector.broadcast %cst_191 : f32 to vector<16x256xf32>
    %c32_192 = arith.constant 32 : index
    %c0_193 = arith.constant 0 : index
    %394 = vector.load %arg8[%c32_192, %c0_193] : memref<144x256xf32, #tpu.memory_space<vmem>>, vector<16x256xf32>
    tpu.vector_store %arg8[%c32_192, %c0_193], %393 {strides = array<i32>} : memref<144x256xf32, #tpu.memory_space<vmem>>, vector<16x256xf32>,
    %cst_194 = arith.constant 0.000000e+00 : f32
    %395 = vector.broadcast %cst_194 : f32 to vector<16x256xf32>
    %c48_195 = arith.constant 48 : index
    %c0_196 = arith.constant 0 : index
    %396 = vector.load %arg8[%c48_195, %c0_196] : memref<144x256xf32, #tpu.memory_space<vmem>>, vector<16x256xf32>
    tpu.vector_store %arg8[%c48_195, %c0_196], %395 {strides = array<i32>} : memref<144x256xf32, #tpu.memory_space<vmem>>, vector<16x256xf32>,
    %c64_197 = arith.constant 64 : index
    %c0_198 = arith.constant 0 : index
    %397 = vector.load %arg8[%c64_197, %c0_198] : memref<144x256xf32, #tpu.memory_space<vmem>>, vector<16x256xf32>
    tpu.vector_store %arg8[%c64_197, %c0_198], %1 {strides = array<i32>} : memref<144x256xf32, #tpu.memory_space<vmem>>, vector<16x256xf32>,
    %cst_199 = arith.constant 0.000000e+00 : f32
    %398 = vector.broadcast %cst_199 : f32 to vector<16x256xf32>
    %c80_200 = arith.constant 80 : index
    %c0_201 = arith.constant 0 : index
    %399 = vector.load %arg8[%c80_200, %c0_201] : memref<144x256xf32, #tpu.memory_space<vmem>>, vector<16x256xf32>
    tpu.vector_store %arg8[%c80_200, %c0_201], %398 {strides = array<i32>} : memref<144x256xf32, #tpu.memory_space<vmem>>, vector<16x256xf32>,
    %cst_202 = arith.constant 0.000000e+00 : f32
    %400 = vector.broadcast %cst_202 : f32 to vector<16x256xf32>
    %c96_203 = arith.constant 96 : index
    %c0_204 = arith.constant 0 : index
    %401 = vector.load %arg8[%c96_203, %c0_204] : memref<144x256xf32, #tpu.memory_space<vmem>>, vector<16x256xf32>
    tpu.vector_store %arg8[%c96_203, %c0_204], %400 {strides = array<i32>} : memref<144x256xf32, #tpu.memory_space<vmem>>, vector<16x256xf32>,
    %cst_205 = arith.constant 0.000000e+00 : f32
    %402 = vector.broadcast %cst_205 : f32 to vector<16x256xf32>
    %c112_206 = arith.constant 112 : index
    %c0_207 = arith.constant 0 : index
    %403 = vector.load %arg8[%c112_206, %c0_207] : memref<144x256xf32, #tpu.memory_space<vmem>>, vector<16x256xf32>
    tpu.vector_store %arg8[%c112_206, %c0_207], %402 {strides = array<i32>} : memref<144x256xf32, #tpu.memory_space<vmem>>, vector<16x256xf32>,
    %cst_208 = arith.constant 0.000000e+00 : f32
    %404 = vector.broadcast %cst_208 : f32 to vector<16x256xf32>
    %c128_209 = arith.constant 128 : index
    %c0_210 = arith.constant 0 : index
    %405 = vector.load %arg8[%c128_209, %c0_210] : memref<144x256xf32, #tpu.memory_space<vmem>>, vector<16x256xf32>
    tpu.vector_store %arg8[%c128_209, %c0_210], %404 {strides = array<i32>} : memref<144x256xf32, #tpu.memory_space<vmem>>, vector<16x256xf32>,
    %c2_211 = arith.constant 2 : index
    %c0_212 = arith.constant 0 : index
    %c0_213 = arith.constant 0 : index
    %406 = vector.load %arg3[%c2_211, %c0_212, %c0_213] : memref<3x32x144xf32, #tpu.memory_space<vmem>>, vector<1x32x144xf32>
    %407 = vector.shape_cast %406 : vector<1x32x144xf32> to vector<32x144xf32>
    %c0_214 = arith.constant 0 : index
    %c0_215 = arith.constant 0 : index
    %408 = vector.load %arg8[%c0_214, %c0_215] : memref<144x256xf32, #tpu.memory_space<vmem>>, vector<144x256xf32>
    %cst_216 = arith.constant dense<0.000000e+00> : vector<32x256xf32>
    %409 = tpu.matmul %407, %408, %cst_216 {dimension_numbers = #tpu.dot_dimension_numbers<[1], [0], [0], [1], [0, 0, 1, 1], [], []>} : vector<32x144xf32>, vector<144x256xf32>, vector<32x256xf32> -> vector<32x256xf32>
    %c3 = arith.constant 3 : index
    %c0_217 = arith.constant 0 : index
    %c0_218 = arith.constant 0 : index
    %410 = vector.load %arg4[%c3, %c0_217, %c0_218] : memref<4x32x1xf32, #tpu.memory_space<vmem>>, vector<1x32x1xf32>
    %411 = vector.shape_cast %410 : vector<1x32x1xf32> to vector<32x1xf32>
    %412 = vector.broadcast %411 : vector<32x1xf32> to vector<32x256xf32>
    %413 = arith.addf %409, %412 : vector<32x256xf32>
    %cst_219 = arith.constant 0.000000e+00 : f32
    %414 = vector.broadcast %cst_219 : f32 to vector<32x256xf32>
    %415 = arith.maximumf %413, %414 : vector<32x256xf32>
    %c0_220 = arith.constant 0 : index
    %c0_221 = arith.constant 0 : index
    %416 = vector.load %arg9[%c0_220, %c0_221] : memref<32x256xf32, #tpu.memory_space<vmem>>, vector<32x256xf32>
    %c3_222 = arith.constant 3 : index
    %c0_223 = arith.constant 0 : index
    %c0_224 = arith.constant 0 : index
    %417 = vector.load %arg5[%c3_222, %c0_223, %c0_224] : memref<4x32x32xf32, #tpu.memory_space<vmem>>, vector<1x32x32xf32>
    %418 = vector.shape_cast %417 : vector<1x32x32xf32> to vector<32x32xf32>
    %cst_225 = arith.constant dense<0.000000e+00> : vector<32x256xf32>
    %419 = tpu.matmul %418, %415, %cst_225 {dimension_numbers = #tpu.dot_dimension_numbers<[1], [0], [0], [1], [0, 0, 1, 1], [], []>} : vector<32x32xf32>, vector<32x256xf32>, vector<32x256xf32> -> vector<32x256xf32>
    %420 = arith.addf %416, %419 : vector<32x256xf32>
    %c0_226 = arith.constant 0 : index
    %c0_227 = arith.constant 0 : index
    %421 = vector.load %arg9[%c0_226, %c0_227] : memref<32x256xf32, #tpu.memory_space<vmem>>, vector<32x256xf32>
    tpu.vector_store %arg9[%c0_226, %c0_227], %420 {strides = array<i32>} : memref<32x256xf32, #tpu.memory_space<vmem>>, vector<32x256xf32>,
    %c0_228 = arith.constant 0 : index
    %c0_229 = arith.constant 0 : index
    %422 = vector.load %arg9[%c0_228, %c0_229] : memref<32x256xf32, #tpu.memory_space<vmem>>, vector<32x256xf32>
    %cst_230 = arith.constant 0.000000e+00 : f32
    %423 = vector.broadcast %cst_230 : f32 to vector<32x256xf32>
    %424 = arith.maximumf %422, %423 : vector<32x256xf32>
    %c0_231 = arith.constant 0 : index
    %c0_232 = arith.constant 0 : index
    %c0_233 = arith.constant 0 : index
    %425 = vector.load %arg7[%c0_231, %c0_232, %c0_233] : memref<1x32x256xf32, #tpu.memory_space<vmem>>, vector<1x32x256xf32>
    %426 = vector.shape_cast %425 : vector<1x32x256xf32> to vector<32x256xf32>
    %427 = vector.shape_cast %424 : vector<32x256xf32> to vector<1x32x256xf32>
    tpu.vector_store %arg7[%c0_231, %c0_232, %c0_233], %427 {strides = array<i32>} : memref<1x32x256xf32, #tpu.memory_space<vmem>>, vector<1x32x256xf32>,
    return
  }
  func.func @transform_0(%arg0: i32) -> (i32, i32, i32) {
    %c0_i32 = arith.constant 0 : i32
    %c0_i32_0 = arith.constant 0 : i32
    %c0_i32_1 = arith.constant 0 : i32
    return %arg0, %c0_i32, %c0_i32_0 : i32, i32, i32
  }
  func.func @transform_1(%arg0: i32) -> (i32, i32) {
    %c0_i32 = arith.constant 0 : i32
    %c0_i32_0 = arith.constant 0 : i32
    %c0_i32_1 = arith.constant 0 : i32
    return %c0_i32, %c0_i32_0 : i32, i32
  }
  func.func @transform_2(%arg0: i32) -> (i32, i32, i32) {
    %c0_i32 = arith.constant 0 : i32
    %c0_i32_0 = arith.constant 0 : i32
    %c0_i32_1 = arith.constant 0 : i32
    %c0_i32_2 = arith.constant 0 : i32
    return %c0_i32, %c0_i32_0, %c0_i32_1 : i32, i32, i32
  }
  func.func @transform_3(%arg0: i32) -> (i32, i32, i32) {
    %c0_i32 = arith.constant 0 : i32
    %c0_i32_0 = arith.constant 0 : i32
    %c0_i32_1 = arith.constant 0 : i32
    %c0_i32_2 = arith.constant 0 : i32
    return %c0_i32, %c0_i32_0, %c0_i32_1 : i32, i32, i32
  }
  func.func @transform_4(%arg0: i32) -> (i32, i32, i32) {
    %c0_i32 = arith.constant 0 : i32
    %c0_i32_0 = arith.constant 0 : i32
    %c0_i32_1 = arith.constant 0 : i32
    %c0_i32_2 = arith.constant 0 : i32
    return %c0_i32, %c0_i32_0, %c0_i32_1 : i32, i32, i32
  }
  func.func @transform_5(%arg0: i32) -> (i32, i32, i32) {
    %c0_i32 = arith.constant 0 : i32
    %c0_i32_0 = arith.constant 0 : i32
    %c0_i32_1 = arith.constant 0 : i32
    return %arg0, %c0_i32, %c0_i32_0 : i32, i32, i32
  }
  func.func @transform_6(%arg0: i32) -> (i32, i32, i32) {
    %c0_i32 = arith.constant 0 : i32
    %c0_i32_0 = arith.constant 0 : i32
    %c0_i32_1 = arith.constant 0 : i32
    return %arg0, %c0_i32, %c0_i32_0 : i32, i32, i32
  }
}

</mosaic_0001>

<bundles_post_ra>
// kernel: aspp_forward.1
= control target key start
LH: loop header
LB: loop body
LE: loop exit
PB: predicated region body
PF: predicated region fallthrough
CT: control target
= control target key end

     0   :  { %s2368_s21 = smov 0   ;;  %s3020_s0 = inlined_call_operand.vmem [shape: f32[2,16,256], index: 0, kind: input, shape index: {}]   ;;  %s3021_s1 = inlined_call_operand.vmem [shape: f32[32,16], index: 1, kind: input, shape index: {}]   ;;  %s3022_s2 = inlined_call_operand.vmem [shape: f32[3,32,144], index: 2, kind: input, shape index: {}]   ;;  %s3023_s3 = inlined_call_operand.vmem [shape: f32[4,32,1], index: 3, kind: input, shape index: {}]   ;;  %s3024_s4 = inlined_call_operand.vmem [shape: f32[4,32,32], index: 4, kind: input, shape index: {}]   ;;  %s3025_s5 = inlined_call_operand.vmem [shape: f32[2,32,1], index: 5, kind: input, shape index: {}]   ;;  %s3026_s6 = inlined_call_operand.vmem [shape: f32[2,32,256], index: 6, kind: output, shape index: {}]  }
   0x1 LB: > { %s2145_s22 = sadd.s32 4294967295, %s2316_s21   ;;  %p2149_p0 = scmp.ge.s32.totalorder %s2316_s21, 1  ;;  %s2316_s21 = sphi %s2368_s21, %s16_s21  }
   0x2   : > { %p222_p1 = scmp.lt.s32.totalorder %s2316_s21, 3 }
   0x4   : > { %p223_p2 = pnand %p2149_p0, %p222_p1 }
   0x5   : > { %p257_p3 = scmp.lt.s32.totalorder (!%p223_p2), %s2145_s22, 1  ;;  %s2320_s27 = smov (!%p223_p2), 32  }
   0x6   : > { %226 = sbr.rel (%p223_p2) target bundleno = 1119 (0x45f), region = 44  ;;  %s2321_s8 = smov (!%p223_p2), 38  }
   0x7   : > { %s2322_s13 = smov (!%p223_p2), 122   ;;  %s2323_s14 = smov (!%p223_p2), 6  }
   0x8   : > { %s2324_s15 = smov (!%p223_p2), 90   ;;  %s2325_s16 = smov (!%p223_p2), 96  }
   0x9   : > { %s2326_s17 = smov (!%p223_p2), 102   ;;  %s2327_s20 = smov (!%p223_p2), 26  }
   0xa   : > { %s2329_s18 = smov (!%p223_p2), 76   ;;  %s2330_s19 = smov (!%p223_p2), 116  }
   0xb   : > { %v2318_v0 = vmov 0.0   ;;  %s3032_s22 = smov (!%p257_p3, %s2145_s22), 1  ;;  %v2319_v1 = vmov 0   ;;  %v303_v6 = vld [vmem:[%s3021_s1] sm:$0xff]  ;;  %vm331_vm0 = vcmask 130048   ;;  %v304_v7 = vld [vmem:[%s3021_s1 + $0x8] sm:$0xff]  ;;  %v276_v19 = vlaneseq }
   0xc   : > { %408 = vmatprep.mubr.f32.mxu0 %v2318_v0  ;;  %546 = vmatprep.mubr.f32.mxu1 %v2318_v0  ;;  %s2230_s23 = sshll.u32 %s3032_s22, 5  ;;  %v305_v8 = vld [vmem:[%s3021_s1 + $0x10] sm:$0xff]  ;;  %v306_v9 = vld [vmem:[%s3021_s1 + $0x18] sm:$0xff]  ;;  %v856_v10 = vld [vmem:[%s3022_s2 + $0x8] sm:$0xff]  ;;  %s2332_s24 = smov 52  }
   0xd   : > { %2305 = vset.pattern.permute.xlu1 %v2319_v1  ;;  %2304 = vset.pattern.permute.xlu0 %v2319_v1  ;;  %s2386_s26 = scalar_lea.vmem %s3020_s0, %s2230_s23  ;;  %v310_v11 = vld [vmem:[%s3023_s3 + $0x18] sm:$0xff]  ;;  %v309_v12 = vld [vmem:[%s3023_s3 + $0x10] sm:$0xff]  ;;  %v307_v13 = vld [vmem:[%s3023_s3] sm:$0xff]  ;;  %v2495_v20 = vand.u32 127, %v276_v19 }
   0xe   : > { %v2389_v2 = vld [vmem:[%s2386_s26 + $0x18] sm:$0xff]  ;;  %v2392_v3 = vld [vmem:[%s2386_s26 + $0x10] sm:$0xff]  ;;  %v2395_v4 = vld [vmem:[%s2386_s26] sm:$0xff] }
   0xf   : > { %372 = vmatprep.subr.mxu0 %v2389_v2  ;;  %789 = vrot.lane.b32.xlu0 %v2392_v3, %s2320_s27  ;;  %v2400_v5 = vld [vmem:[%s2386_s26 + $0x8] sm:$0xff]  ;;  %v2166_v15 = vld [vmem:[%s3023_s3 + $0x30] sm:$0xff]  ;;  %v2167_v16 = vld [vmem:[%s3023_s3 + $0x38] sm:$0xff]  ;;  %v2500_v21 = vadd.s32 128, %v2495_v20  ;;  %v2511_v25 = vand.u32 15, %v2495_v20  ;;  %vm795_vm1 = vcmp.lt.s32.totalorder %v2495_v20, 32 }
  0x10   : > { %787 = vrot.lane.b32.xlu1 %v2395_v4, %s2320_s27  ;;  %373 = vmatpush1.msra.mxu0 %v2392_v3  ;;  %v308_v14 = vld [vmem:[%s3023_s3 + $0x8] sm:$0xff]  ;;  %v2164_v17 = vld [vmem:[%s3023_s3 + $0x20] sm:$0xff]  ;;  %v2190_v29 = vld [vmem:[%s3023_s3 + $0x50] sm:$0xff]  ;;  %vm760_vm5 = vcmp.lt.s32.totalorder %v2495_v20, 38  ;;  %vm735_vm8 = vcmp.lt.s32.totalorder %v2495_v20, 122  ;;  %vm706_vm11 = vcmp.lt.s32.totalorder %v2495_v20, 6 }
  0x11   : > { %374 = vmatprep.subr.mxu0 %v2400_v5  ;;  %v2165_v18 = vld [vmem:[%s3023_s3 + $0x28] sm:$0xff]  ;;  %v2505_v22 = vand.u32 15, %v2500_v21  ;;  %v801_v23 = vadd.s32 96, %v2500_v21  ;;  %v766_v28 = vadd.s32 90, %v2500_v21  ;;  %v2524_v31 = vadd.s32 4294967290, %v2511_v25  ;;  %v2191_v32 = vld [vmem:[%s3023_s3 + $0x58] sm:$0xff] }
  0x12   : > { %375 = vmatpush1.msra.mxu0 %v2395_v4  ;;  %v2188_v37 = vld [vmem:[%s3023_s3 + $0x40] sm:$0xff]  ;;  %v2189_v41 = vld [vmem:[%s3023_s3 + $0x48] sm:$0xff]  ;;  %v2214_v45 = vld [vmem:[%s3023_s3 + $0x70] sm:$0xff]  ;;  %v2572_v50 = vadd.s32 6, %v2511_v25  ;;  %vm663_vm13 = vcmp.lt.s32.totalorder %v2495_v20, 90  ;;  %vm630_vm15 = vcmp.lt.s32.totalorder %v2495_v20, 96 }
  0x13   : > { %793 = vrot.lane.b32.xlu0 %v2389_v2, %s2320_s27  ;;  %2156 = vmatmul.mubr.msk.f32.vlgmr.msra.gmra.mxu0 %vm331_vm0, %v303_v6  ;;  %v2514_v27 = vadd.s32 4294967290, %v2505_v22  ;;  %vm805_vm2 = vcmp.lt.s32.totalorder %v801_v23, 256  ;;  %vm770_vm4 = vcmp.lt.s32.totalorder %v766_v28, 256  ;;  %vm594_vm7 = vcmp.ge.s32.totalorder %v2524_v31, 0  ;;  %v2215_v48 = vld [vmem:[%s3023_s3 + $0x78] sm:$0xff]  ;;  %v2212_v53 = vld [vmem:[%s3023_s3 + $0x60] sm:$0xff] }
  0x14   : > { %791 = vrot.lane.b32.xlu1 %v2400_v5, %s2320_s27  ;;  %414 = vmatprep.mubr.f32.mxu0 %v2318_v0  ;;  %v2566_v47 = vadd.s32 6, %v2505_v22  ;;  %v2213_v55 = vld [vmem:[%s3023_s3 + $0x68] sm:$0xff]  ;;  %vm672_vm10 = vcmp.lt.s32.totalorder %v2572_v50, 16  ;;  %v635_v28 = vadd.s32 4294967200, %v2495_v20  ;;  %v862_v50 = vld [vmem:[%s3022_s2 + $0x38] sm:$0xff] }
  0x15   : > { %vm595_vm3 = vcmp.ge.s32.totalorder %v2514_v27, 0  ;;  %v855_v27 = vld [vmem:[%s3022_s2] sm:$0xff] }
  0x16   : > { %vm2546_vm6 = vmand %vm595_vm3, %vm770_vm4  ;;  %vm673_vm9 = vcmp.lt.s32.totalorder %v2566_v47, 16  ;;  %vm587_vm4 = vcmp.lt.s32.totalorder %v2495_v20, 102  ;;  %v858_v47 = vld [vmem:[%s3022_s2 + $0x18] sm:$0xff] }
  0x17   : > { %754 = vrot.lane.b32.xlu0 %v2392_v3, %s2321_s8  ;;  %2157 = vmatmul.mubr.msk.f32.gmra.mxu0 %vm331_vm0, %v304_v7 }
  0x18   : > { %758 = vrot.lane.b32.xlu1 %v2389_v2, %s2321_s8  ;;  %420 = vmatprep.mubr.f32.mxu0 %v2318_v0 }
  0x1b   : > { %752 = vrot.lane.b32.xlu0 %v2395_v4, %s2321_s8  ;;  %2158 = vmatmul.mubr.msk.f32.gmra.mxu0 %vm331_vm0, %v305_v8 }
  0x1c   : > { %756 = vrot.lane.b32.xlu1 %v2400_v5, %s2321_s8  ;;  %426 = vmatprep.mubr.f32.mxu0 %v2318_v0 }
  0x1f   : > { %729 = vrot.lane.b32.xlu0 %v2392_v3, %s2322_s13  ;;  %2159 = vmatmul.mubr.msk.f32.gmra.mxu0 %vm331_vm0, %v306_v9 }
  0x20   : > { %733 = vrot.lane.b32.xlu1 %v2389_v2, %s2322_s13  ;;  %2168 = vmatprep.mubr.msk.f32.mxu0 %vm331_vm0, %v856_v10  ;;  %v676_v10 = vadd.s32 4294967206, %v2495_v20 }
  0x22   : > { %vm678_vm12 = vcmp.ge.s32.totalorder %v676_v10, 0 }
  0x23   : > { %727 = vrot.lane.b32.xlu0 %v2395_v4, %s2322_s13  ;;  %vm684_vm14 = vmand %vm672_vm10, %vm678_vm12 }
  0x24   : > { %731 = vrot.lane.b32.xlu1 %v2400_v5, %s2322_s13  ;;  %s2232_s13 = sshll.u32 %s3032_s22, 6 }
  0x27   : > { %700 = vrot.lane.b32.xlu0 %v2392_v3, %s2323_s14 }
  0x28   : > { %704 = vrot.lane.b32.xlu1 %v2389_v2, %s2323_s14 }
  0x2b   : > { %698 = vrot.lane.b32.xlu0 %v2395_v4, %s2323_s14 }
  0x2c   : > { %702 = vrot.lane.b32.xlu1 %v2400_v5, %s2323_s14 }
  0x2f   : > { %657 = vrot.lane.b32.xlu0 %v2392_v3, %s2324_s15 }
  0x30   : > { %661 = vrot.lane.b32.xlu1 %v2389_v2, %s2324_s15 }
  0x33   : > { %655 = vrot.lane.b32.xlu0 %v2395_v4, %s2324_s15 }
  0x34   : > { %659 = vrot.lane.b32.xlu1 %v2400_v5, %s2324_s15 }
  0x37   : > { %624 = vrot.lane.b32.xlu0 %v2392_v3, %s2325_s16 }
  0x38   : > { %628 = vrot.lane.b32.xlu1 %v2389_v2, %s2325_s16 }
  0x3b   : > { %622 = vrot.lane.b32.xlu0 %v2395_v4, %s2325_s16 }
  0x3c   : > { %626 = vrot.lane.b32.xlu1 %v2400_v5, %s2325_s16  ;;  %s271_s16 = scalar_lea.vmem %s3026_s6, %s2232_s13 }
  0x3f   : > { %581 = vrot.lane.b32.xlu0 %v2392_v3, %s2326_s17 }
  0x40   : > { %585 = vrot.lane.b32.xlu1 %v2389_v2, %s2326_s17 }
  0x43   : > { %579 = vrot.lane.b32.xlu0 %v2395_v4, %s2326_s17 }
  0x44   : > { %583 = vrot.lane.b32.xlu1 %v2400_v5, %s2326_s17  ;;  %s2328_s17 = smov 64  }
  0x47   : > { %822 = vrot.lane.b32.xlu0 %v2392_v3, %s2327_s20 }
  0x48   : > { %826 = vrot.lane.b32.xlu1 %v2389_v2, %s2327_s20 }
  0x4b   : > { %820 = vrot.lane.b32.xlu0 %v2395_v4, %s2327_s20 }
  0x4c   : > { %824 = vrot.lane.b32.xlu1 %v2400_v5, %s2327_s20  ;;  %s2331_s20 = smov 12  }
  0x4f   : > { %328 = vperm.xlu0 %2304, %v310_v11  }
  0x50   : > { %323 = vperm.xlu1 %2305, %v309_v12  }
  0x53   : > { %313 = vperm.xlu0 %2304, %v307_v13  }
  0x54   : > { %318 = vperm.xlu1 %2305, %v308_v14  }
  0x57   : > { %916 = vperm.xlu0 %2304, %v2166_v15  }
  0x58   : > { %921 = vperm.xlu1 %2305, %v2167_v16  }
  0x5b   : > { %906 = vperm.xlu0 %2304, %v2164_v17  }
  0x5c   : > { %911 = vperm.xlu1 %2305, %v2165_v18  }
  0x5f   : > { %1212 = vrot.lane.b32.xlu0 %v2389_v2, %s2328_s17 }
  0x60   : > { %1208 = vrot.lane.b32.xlu1 %v2392_v3, %s2328_s17 }
  0x63   : > { %1210 = vrot.lane.b32.xlu0 %v2400_v5, %s2328_s17 }
  0x64   : > { %1206 = vrot.lane.b32.xlu1 %v2395_v4, %s2328_s17 }
  0x67   : > { %1169 = vrot.lane.b32.xlu0 %v2389_v2, %s2329_s18 }
  0x68   : > { %1165 = vrot.lane.b32.xlu1 %v2392_v3, %s2329_s18 }
  0x6b   : > { %1167 = vrot.lane.b32.xlu0 %v2400_v5, %s2329_s18 }
  0x6c   : > { %1163 = vrot.lane.b32.xlu1 %v2395_v4, %s2329_s18 }
  0x6f   : > { %1317 = vrot.lane.b32.xlu0 %v2389_v2, %s2330_s19 }
  0x70   : > { %1313 = vrot.lane.b32.xlu1 %v2392_v3, %s2330_s19 }
  0x73   : > { %1315 = vrot.lane.b32.xlu0 %v2400_v5, %s2330_s19 }
  0x74   : > { %1311 = vrot.lane.b32.xlu1 %v2395_v4, %s2330_s19 }
  0x77   : > { %1288 = vrot.lane.b32.xlu0 %v2389_v2, %s2331_s20 }
  0x78   : > { %1284 = vrot.lane.b32.xlu1 %v2392_v3, %s2331_s20 }
  0x7b   : > { %1286 = vrot.lane.b32.xlu0 %v2400_v5, %s2331_s20 }
  0x7c   : > { %1282 = vrot.lane.b32.xlu1 %v2395_v4, %s2331_s20  ;;  %s266_s20 = scalar_lea.vmem %s3025_s5, %s2230_s23 }
  0x7d   : > { %v446_v59 = vld [vmem:[%s266_s20 + $0x8] sm:$0xff]  ;;  %v445_v61 = vld [vmem:[%s266_s20] sm:$0xff]  ;;  %v448_v6 = vld [vmem:[%s266_s20 + $0x18] sm:$0xff] }
  0x7e   : > { %v447_v8 = vld [vmem:[%s266_s20 + $0x10] sm:$0xff] }
  0x7f   : > { %1245 = vrot.lane.b32.xlu0 %v2389_v2, %s2332_s24 }
  0x80   : > { %1241 = vrot.lane.b32.xlu1 %v2392_v3, %s2332_s24 }
  0x81   : > { %v790_v24 = vpop.permute.xlu0 %789 }
  0x82   : > { %v788_v26 = vpop.permute.xlu1 %787 }
  0x83   : > { %1243 = vrot.lane.b32.xlu0 %v2400_v5, %s2332_s24 }
  0x84   : > { %1239 = vrot.lane.b32.xlu1 %v2395_v4, %s2332_s24 }
  0x85   : > { %v794_v30 = vpop.permute.xlu0 %793 }
  0x86   : > { %v797_v33 = vsel %vm795_vm1, %v790_v24, %v794_v30  ;;  %v799_v34 = vsel %vm795_vm1, %v794_v30, %v790_v24  ;;  %v792_v35 = vpop.permute.xlu1 %791 }
  0x87   : > { %2233 = vmatprep.subr.msk.mxu0 %vm805_vm2, %v799_v34  ;;  %1462 = vperm.xlu0 %2304, %v2190_v29   ;;  %v798_v36 = vsel %vm795_vm1, %v792_v35, %v788_v26  ;;  %v796_v38 = vsel %vm795_vm1, %v788_v26, %v792_v35  ;;  %vm637_vm1 = vcmp.ge.s32.totalorder %v635_v28, 0 }
  0x88   : > { %937 = vmatpush1.msra.mxu0 %v797_v33  ;;  %1467 = vperm.xlu1 %2305, %v2191_v32  }
  0x89   : > { %v755_v39 = vpop.permute.xlu0 %754  ;;  %2234 = vmatprep.subr.msk.mxu0 %vm805_vm2, %v798_v36  ;;  %v600_v36 = vadd.s32 4294967194, %v2495_v20 }
  0x8a   : > { %v759_v42 = vpop.permute.xlu1 %758  ;;  %939 = vmatpush1.msra.mxu0 %v796_v38 }
  0x8b   : > { %v762_v43 = vsel %vm760_vm5, %v755_v39, %v759_v42  ;;  %v764_v44 = vsel %vm760_vm5, %v759_v42, %v755_v39  ;;  %1452 = vperm.xlu0 %2304, %v2188_v37   ;;  %vm602_vm2 = vcmp.ge.s32.totalorder %v600_v36, 0 }
  0x8c   : > { %2235 = vmatprep.subr.msk.mxu0 %vm2546_vm6, %v764_v44  ;;  %1457 = vperm.xlu1 %2305, %v2189_v41  }
  0x8d   : > { %2236 = vmatpush1.msk.msra.mxu0 %vm594_vm7, %v762_v43  ;;  %v753_v46 = vpop.permute.xlu0 %752  ;;  %v834_v43 = vadd.s32 102, %v2500_v21 }
  0x8e   : > { %v757_v49 = vpop.permute.xlu1 %756 }
  0x8f   : > { %v761_v51 = vsel %vm760_vm5, %v753_v46, %v757_v49  ;;  %v763_v52 = vsel %vm760_vm5, %v757_v49, %v753_v46  ;;  %1807 = vperm.xlu0 %2304, %v2214_v45   ;;  %vm608_vm5 = vmand %vm594_vm7, %vm602_vm2 }
  0x90   : > { %2237 = vmatprep.subr.msk.mxu0 %vm2546_vm6, %v763_v52  ;;  %1812 = vperm.xlu1 %2305, %v2215_v48   ;;  %vm838_vm6 = vcmp.lt.s32.totalorder %v834_v43, 256 }
  0x91   : > { %2238 = vmatpush1.msk.msra.mxu0 %vm594_vm7, %v761_v51  ;;  %v730_v54 = vpop.permute.xlu0 %729 }
  0x92   : > { %v734_v56 = vpop.permute.xlu1 %733 }
  0x93   : > { %v737_v57 = vsel %vm735_vm8, %v730_v54, %v734_v56  ;;  %v739_v58 = vsel %vm735_vm8, %v734_v56, %v730_v54  ;;  %1797 = vperm.xlu0 %2304, %v2212_v53  }
  0x94   : > { %2239 = vmatprep.subr.msk.mxu0 %vm673_vm9, %v739_v58  ;;  %1802 = vperm.xlu1 %2305, %v2213_v55  }
  0x95   : > { %2240 = vmatpush1.msk.msra.mxu0 %vm672_vm10, %v737_v57  ;;  %v728_v60 = vpop.permute.xlu0 %727 }
  0x96   : > { %v732_v62 = vpop.permute.xlu1 %731 }
  0x97   : > { %v736_v63 = vsel %vm735_vm8, %v728_v60, %v732_v62  ;;  %v738_v1 = vsel %vm735_vm8, %v732_v62, %v728_v60  ;;  %456 = vperm.xlu0 %2304, %v446_v59   ;;  %vm828_vm8 = vcmp.lt.s32.totalorder %v2495_v20, 26  ;;  %v857_v59 = vld [vmem:[%s3022_s2 + $0x10] sm:$0xff]  ;;  %v860_v60 = vld [vmem:[%s3022_s2 + $0x28] sm:$0xff] }
  0x98   : > { %2241 = vmatprep.subr.msk.mxu0 %vm673_vm9, %v738_v1  ;;  %451 = vperm.xlu1 %2305, %v445_v61   ;;  %v859_v61 = vld [vmem:[%s3022_s2 + $0x20] sm:$0xff]  ;;  %v861_v62 = vld [vmem:[%s3022_s2 + $0x30] sm:$0xff] }
  0x99   : > { %2242 = vmatpush1.msk.msra.mxu0 %vm672_vm10, %v736_v63  ;;  %v701_v7 = vpop.permute.xlu0 %700 }
  0x9a   : > { %v705_v9 = vpop.permute.xlu1 %704  ;;  %948 = vmatprep.subr.mxu0 %v2389_v2 }
  0x9b   : > { %949 = vmatpush1.msra.mxu0 %v2392_v3  ;;  %466 = vperm.xlu0 %2304, %v448_v6   ;;  %v708_v11 = vsel %vm706_vm11, %v701_v7, %v705_v9  ;;  %v710_v13 = vsel %vm706_vm11, %v705_v9, %v701_v7 }
  0x9c   : > { %950 = vmatprep.subr.mxu0 %v2400_v5  ;;  %461 = vperm.xlu1 %2305, %v447_v8  }
  0x9d   : > { %951 = vmatpush1.msra.mxu0 %v2395_v4  ;;  %v699_v12 = vpop.permute.xlu0 %698 }
  0x9e   : > { %v703_v14 = vpop.permute.xlu1 %702  ;;  %2243 = vmatprep.subr.msk.mxu0 %vm595_vm3, %v708_v11 }
  0x9f   : > { %v707_v15 = vsel %vm706_vm11, %v699_v12, %v703_v14  ;;  %v709_v16 = vsel %vm706_vm11, %v703_v14, %v699_v12  ;;  %2244 = vmatpush1.msk.msra.mxu0 %vm594_vm7, %v710_v13 }
  0xa0   : > { %2245 = vmatprep.subr.msk.mxu0 %vm595_vm3, %v707_v15 }
  0xa1   : > { %2246 = vmatpush1.msk.msra.mxu0 %vm594_vm7, %v709_v16  ;;  %v658_v17 = vpop.permute.xlu0 %657  ;;  %vm842_vm7 = vmand %vm673_vm9, %vm838_vm6 }
  0xa2   : > { %v662_v18 = vpop.permute.xlu1 %661 }
  0xa3   : > { %v665_v19 = vsel %vm663_vm13, %v658_v17, %v662_v18  ;;  %v667_v23 = vsel %vm663_vm13, %v662_v18, %v658_v17 }
  0xa4   : > { %2247 = vmatprep.subr.msk.mxu0 %vm673_vm9, %v665_v19 }
  0xa5   : > { %2248 = vmatpush1.msk.msra.mxu0 %vm684_vm14, %v667_v23  ;;  %v656_v24 = vpop.permute.xlu0 %655 }
  0xa6   : > { %v660_v26 = vpop.permute.xlu1 %659 }
  0xa7   : > { %v664_v29 = vsel %vm663_vm13, %v656_v24, %v660_v26  ;;  %v666_v30 = vsel %vm663_vm13, %v660_v26, %v656_v24  ;;  %vm1171_vm13 = vcmp.lt.s32.totalorder %v2495_v20, 76 }
  0xa8   : > { %2249 = vmatprep.subr.msk.mxu0 %vm673_vm9, %v664_v29  ;;  %vm1214_vm9 = vcmp.lt.s32.totalorder %v2495_v20, 64 }
  0xa9   : > { %2250 = vmatpush1.msk.msra.mxu0 %vm684_vm14, %v666_v30  ;;  %v625_v32 = vpop.permute.xlu0 %624 }
  0xaa   : > { %v629_v33 = vpop.permute.xlu1 %628 }
  0xab   : > { %v634_v34 = vsel %vm630_vm15, %v629_v33, %v625_v32  ;;  %v632_v35 = vsel %vm630_vm15, %v625_v32, %v629_v33 }
  0xac   : > { %960 = vmatprep.subr.mxu0 %v632_v35 }
  0xad   : > { %2251 = vmatpush1.msk.msra.mxu0 %vm637_vm1, %v634_v34  ;;  %v623_v37 = vpop.permute.xlu0 %622 }
  0xae   : > { %v627_v38 = vpop.permute.xlu1 %626 }
  0xaf   : > { %v633_v39 = vsel %vm630_vm15, %v627_v38, %v623_v37  ;;  %v631_v40 = vsel %vm630_vm15, %v623_v37, %v627_v38  ;;  %v441_v38 = vld [vmem:[%s3024_s4] sm:$0xff]  ;;  %vm1319_vm15 = vcmp.lt.s32.totalorder %v2495_v20, 116 }
  0xb0   : > { %962 = vmatprep.subr.mxu0 %v631_v40  ;;  %v443_v40 = vld [vmem:[%s3024_s4 + $0x10] sm:$0xff] }
  0xb1   : > { %2252 = vmatpush1.msk.msra.mxu0 %vm637_vm1, %v633_v39  ;;  %v582_v41 = vpop.permute.xlu0 %581  ;;  %v442_v39 = vld [vmem:[%s3024_s4 + $0x8] sm:$0xff] }
  0xb2   : > { %v586_v42 = vpop.permute.xlu1 %585 }
  0xb3   : > { %v589_v44 = vsel %vm587_vm4, %v582_v41, %v586_v42  ;;  %v591_v45 = vsel %vm587_vm4, %v586_v42, %v582_v41  ;;  %v444_v41 = vld [vmem:[%s3024_s4 + $0x18] sm:$0xff] }
  0xb4   : > { %2253 = vmatprep.subr.msk.mxu0 %vm595_vm3, %v589_v44 }
  0xb5   : > { %2254 = vmatpush1.msk.msra.mxu0 %vm608_vm5, %v591_v45  ;;  %v580_v46 = vpop.permute.xlu0 %579 }
  0xb6   : > { %v584_v48 = vpop.permute.xlu1 %583 }
  0xb7   : > { %v588_v49 = vsel %vm587_vm4, %v580_v46, %v584_v48  ;;  %v590_v51 = vsel %vm587_vm4, %v584_v48, %v580_v46  ;;  %vm1290_vm4 = vcmp.lt.s32.totalorder %v2495_v20, 12 }
  0xb8   : > { %2255 = vmatprep.subr.msk.mxu0 %vm595_vm3, %v588_v49  ;;  %vm469_vm3 = vcmask 261120  }
  0xb9   : > { %2256 = vmatpush1.msk.msra.mxu0 %vm608_vm5, %v590_v51  ;;  %v823_v31 = vpop.permute.xlu0 %822 }
  0xba   : > { %v827_v52 = vpop.permute.xlu1 %826 }
  0xbb   : > { %v830_v53 = vsel %vm828_vm8, %v823_v31, %v827_v52  ;;  %v832_v54 = vsel %vm828_vm8, %v827_v52, %v823_v31 }
  0xbc   : > { %2257 = vmatprep.subr.msk.mxu0 %vm842_vm7, %v832_v54 }
  0xbd   : > { %2258 = vmatpush2.msk.msra.mxu0 %vm672_vm10, %v830_v53  ;;  %v821_v55 = vpop.permute.xlu0 %820 }
  0xbe   : > { %v825_v56 = vpop.permute.xlu1 %824 }
  0xbf   : > { %v829_v57 = vsel %vm828_vm8, %v821_v55, %v825_v56  ;;  %v831_v58 = vsel %vm828_vm8, %v825_v56, %v821_v55  ;;  %vm1247_vm8 = vcmp.lt.s32.totalorder %v2495_v20, 52 }
  0xc0   : > { %2259 = vmatprep.subr.msk.mxu0 %vm842_vm7, %v831_v58 }
  0xc1   : > { %2260 = vmatpush2.msk.msra.mxu0 %vm672_vm10, %v829_v57 }
  0xc2   : > { %1001 = vmatmul.mubr.f32.vlgmr.msra.gmra.mxu0 %v855_v27 }
  0xc3   : > { %2169 = vmatprep.mubr.msk.f32.mxu0 %vm331_vm0, %v858_v47 }
  0xc6   : > { %1007 = vmatmul.mubr.f32.gmra.mxu0 %v857_v59 }
  0xc7   : > { %2170 = vmatprep.mubr.msk.f32.mxu0 %vm331_vm0, %v860_v60 }
  0xca   : > { %1013 = vmatmul.mubr.f32.gmra.mxu0 %v859_v61  ;;  %v329_v11 = vpop.permute.xlu0 %328 }
  0xcb   : > { %2171 = vmatprep.mubr.msk.f32.mxu0 %vm331_vm0, %v862_v50  ;;  %v324_v8 = vpop.permute.xlu1 %323 }
  0xce   : > { %1019 = vmatmul.mubr.f32.gmra.mxu0 %v861_v62  ;;  %v314_v18 = vpop.permute.xlu0 %313 }
  0xcf   : > { %1668 = vmatprep.mubr.f32.mxu0 %v2318_v0  ;;  %v319_v13 = vpop.permute.xlu1 %318 }
  0xd2   : > { %v917_v42 = vpop.permute.xlu0 %916 }
  0xd3   : > { %v410_v63 = vpop.f32.mrf.mxu0  ;;  %v922_v43 = vpop.permute.xlu1 %921 }
  0xd4   : > { %v411_v33 = vadd.f32 %v410_v63, %v314_v18 }
  0xd5   : > { %v412_v1 = vpop.f32.mrf.mxu0 }
  0xd6   : > { %v413_v30 = vadd.f32 %v412_v1, %v314_v18  ;;  %v433_v37 = vmax.f32 %v411_v33, 0.0  ;;  %v907_v44 = vpop.permute.xlu0 %906  ;;  %v1358_v18 = vadd.s32 192, %v2495_v20 }
  0xd7   : > { %v416_v6 = vpop.f32.mrf.mxu0  ;;  %v912_v45 = vpop.permute.xlu1 %911 }
  0xd8   : > { %v417_v24 = vadd.f32 %v416_v6, %v319_v13  ;;  %v434_v36 = vmax.f32 %v413_v30, 0.0  ;;  %vm1362_vm10 = vcmp.lt.s32.totalorder %v1358_v18, 256 }
  0xd9   : > { %v418_v7 = vpop.f32.mrf.mxu0 }
  0xda   : > { %v419_v19 = vadd.f32 %v418_v7, %v319_v13  ;;  %v435_v35 = vmax.f32 %v417_v24, 0.0  ;;  %v1213_v46 = vpop.permute.xlu0 %1212  ;;  %v1336_v24 = vadd.s32 180, %v2495_v20 }
  0xdb   : > { %v422_v9 = vpop.f32.mrf.mxu0  ;;  %v1209_v48 = vpop.permute.xlu1 %1208 }
  0xdc   : > { %v423_v16 = vadd.f32 %v422_v9, %v324_v8  ;;  %v436_v34 = vmax.f32 %v419_v19, 0.0  ;;  %vm1340_vm12 = vcmp.lt.s32.totalorder %v1336_v24, 256  ;;  %v2716_v30 = vsel %vm1214_vm9, %v1213_v46, %v1209_v48  ;;  %v2175_v46 = vld [vmem:[%s3024_s4 + $0x38] sm:$0xff] }
  0xdd   : > { %v424_v10 = vpop.f32.mrf.mxu0  ;;  %v1177_v48 = vadd.s32 4294967284, %v2505_v22 }
  0xde   : > { %v425_v15 = vadd.f32 %v424_v10, %v324_v8  ;;  %v437_v32 = vmax.f32 %v423_v16, 0.0  ;;  %v1211_v49 = vpop.permute.xlu0 %1210 }
  0xdf   : > { %v428_v12 = vpop.f32.mrf.mxu0  ;;  %v1207_v51 = vpop.permute.xlu1 %1206  ;;  %vm1179_vm5 = vcmp.ge.s32.totalorder %v1177_v48, 0 }
  0xe0   : > { %v429_v14 = vadd.f32 %v428_v12, %v329_v11  ;;  %v438_v28 = vmax.f32 %v425_v15, 0.0 }
  0xe1   : > { %v430_v17 = vpop.f32.mrf.mxu0 }
  0xe2   : > { %v431_v23 = vadd.f32 %v430_v17, %v329_v11  ;;  %v439_v26 = vmax.f32 %v429_v14, 0.0  ;;  %v1170_v53 = vpop.permute.xlu0 %1169 }
  0xe3   : > { %v1166_v54 = vpop.permute.xlu1 %1165 }
  0xe4   : > { %v440_v29 = vmax.f32 %v431_v23, 0.0  ;;  %v2706_v23 = vadd.s32 4294967284, %v2511_v25 }
  0xe6   : > { %506 = vmatprep.subr.mxu1 %v440_v29  ;;  %v2696_v58 = vpop.permute.xlu0 %1167  ;;  %v2172_v29 = vld [vmem:[%s3024_s4 + $0x20] sm:$0xff]  ;;  %vm1178_vm11 = vcmp.ge.s32.totalorder %v2706_v23, 0 }
  0xe7   : > { %507 = vmatpush1.msra.mxu1 %v439_v26  ;;  %v2698_v27 = vpop.permute.xlu1 %1163  ;;  %vm2735_vm14 = vmand %vm1178_vm11, %vm1340_vm12 }
  0xe8   : > { %508 = vmatprep.subr.mxu1 %v438_v28 }
  0xe9   : > { %509 = vmatpush1.msra.mxu1 %v437_v32 }
  0xea   : > { %510 = vmatprep.subr.mxu1 %v436_v34  ;;  %v2700_v50 = vpop.permute.xlu0 %1317  ;;  %v2173_v34 = vld [vmem:[%s3024_s4 + $0x28] sm:$0xff] }
  0xeb   : > { %511 = vmatpush1.msra.mxu1 %v435_v35  ;;  %v2702_v62 = vpop.permute.xlu1 %1313  ;;  %v1253_v35 = vadd.s32 12, %v2505_v22 }
  0xec   : > { %512 = vmatprep.subr.mxu1 %v434_v36  ;;  %v2730_v36 = vsel %vm1214_vm9, %v1211_v49, %v1207_v51  ;;  %v1261_v51 = vadd.s32 4294967116, %v2500_v21 }
  0xed   : > { %513 = vmatpush1.msra.mxu1 %v433_v37  ;;  %vm1257_vm1 = vcmp.lt.s32.totalorder %v1253_v35, 16 }
  0xee   : > { %2160 = vmatmul.mubr.msk.f32.vlgmr.msra.gmra.mxu1 %vm469_vm3, %v441_v38  ;;  %v1316_v15 = vpop.permute.xlu0 %1315  ;;  %v2740_v38 = vadd.s32 12, %v2511_v25  ;;  %v2174_v25 = vld [vmem:[%s3024_s4 + $0x30] sm:$0xff]  ;;  %vm1263_vm6 = vcmp.ge.s32.totalorder %v1261_v51, 0 }
  0xef   : > { %552 = vmatprep.mubr.f32.mxu1 %v2318_v0  ;;  %v1312_v16 = vpop.permute.xlu1 %1311  ;;  %vm1269_vm7 = vmand %vm1257_vm1, %vm1263_vm6 }
  0xf0   : > { %vm1256_vm2 = vcmp.lt.s32.totalorder %v2740_v38, 16  ;;  %v1320_v49 = vsel %vm1319_vm15, %v1312_v16, %v1316_v15 }
  0xf2   : > { %2161 = vmatmul.mubr.msk.f32.gmra.mxu1 %vm469_vm3, %v442_v39  ;;  %v1289_v32 = vpop.permute.xlu0 %1288  ;;  %v2746_v39 = vsel %vm1171_vm13, %v1170_v53, %v1166_v54 }
  0xf3   : > { %558 = vmatprep.mubr.f32.mxu1 %v2318_v0  ;;  %v1285_v33 = vpop.permute.xlu1 %1284 }
  0xf4   : > { %v1292_v22 = vsel %vm1290_vm4, %v1285_v33, %v1289_v32  ;;  %v1294_v54 = vsel %vm1290_vm4, %v1289_v32, %v1285_v33 }
  0xf6   : > { %2162 = vmatmul.mubr.msk.f32.gmra.mxu1 %vm469_vm3, %v443_v40  ;;  %v1174_v40 = vsel %vm1171_vm13, %v2696_v58, %v2698_v27  ;;  %v1378_v27 = vadd.s32 204, %v2495_v20  ;;  %v2180_v20 = vld [vmem:[%s3022_s2 + $0x40] sm:$0xff] }
  0xf7   : > { %564 = vmatprep.mubr.f32.mxu1 %v2318_v0 }
  0xfa   : > { %2163 = vmatmul.mubr.msk.f32.gmra.mxu1 %vm469_vm3, %v444_v41  ;;  %v1287_v41 = vpop.permute.xlu0 %1286 }
  0xfb   : > { %1122 = vmatprep.mubr.f32.mxu1 %v2318_v0 }
 0x182   : > { %v1002_v31 = vpop.f32.mrf.mxu0 }
 0x183   : > { %v1003_v13 = vadd.f32 %v1002_v31, %v907_v44  ;;  %v2181_v31 = vld [vmem:[%s3022_s2 + $0x48] sm:$0xff] }
 0x184   : > { %v1004_v52 = vpop.f32.mrf.mxu0 }
 0x185   : > { %v1005_v11 = vadd.f32 %v1004_v52, %v907_v44  ;;  %v1025_v28 = vmax.f32 %v1003_v13, 0.0  ;;  %v1321_v44 = vsel %vm1319_vm15, %v2702_v62, %v2700_v50  ;;  %v1246_v52 = vpop.permute.xlu0 %1245 }
 0x186   : > { %v1008_v55 = vpop.f32.mrf.mxu0 }
 0x187   : > { %v1009_v9 = vadd.f32 %v1008_v55, %v912_v45  ;;  %v1026_v26 = vmax.f32 %v1005_v11, 0.0 }
 0x188   : > { %v1010_v56 = vpop.f32.mrf.mxu0 }
 0x189   : > { %v1011_v7 = vadd.f32 %v1010_v56, %v912_v45  ;;  %v1027_v19 = vmax.f32 %v1009_v9, 0.0  ;;  %v1322_v45 = vsel %vm1319_vm15, %v1316_v15, %v1312_v16  ;;  %v1185_v56 = vadd.s32 4294967092, %v2500_v21 }
 0x18a   : > { %v1014_v57 = vpop.f32.mrf.mxu0 }
 0x18b   : > { %v1015_v6 = vadd.f32 %v1014_v57, %v917_v42  ;;  %v1028_v17 = vmax.f32 %v1011_v7, 0.0 }
 0x18c   : > { %v1016_v47 = vpop.f32.mrf.mxu0 }
 0x18d   : > { %v1017_v63 = vadd.f32 %v1016_v47, %v917_v42  ;;  %v1029_v14 = vmax.f32 %v1015_v6, 0.0  ;;  %v1283_v42 = vpop.permute.xlu1 %1282  ;;  %v2182_v47 = vld [vmem:[%s3022_s2 + $0x50] sm:$0xff] }
 0x18e   : > { %v1020_v59 = vpop.f32.mrf.mxu0 }
 0x18f   : > { %v1021_v60 = vadd.f32 %v1020_v59, %v922_v43  ;;  %v1030_v12 = vmax.f32 %v1017_v63, 0.0  ;;  %v2185_v59 = vld [vmem:[%s3022_s2 + $0x68] sm:$0xff] }
 0x190   : > { %v1022_v61 = vpop.f32.mrf.mxu0 }
 0x191   : > { %v1023_v1 = vadd.f32 %v1022_v61, %v922_v43  ;;  %v1031_v10 = vmax.f32 %v1021_v60, 0.0  ;;  %v1323_v43 = vsel %vm1319_vm15, %v2700_v50, %v2702_v62  ;;  %v1242_v53 = vpop.permute.xlu1 %1241  ;;  %v2184_v60 = vld [vmem:[%s3022_s2 + $0x60] sm:$0xff]  ;;  %v2187_v61 = vld [vmem:[%s3022_s2 + $0x78] sm:$0xff]  ;;  %v2186_v50 = vld [vmem:[%s3022_s2 + $0x70] sm:$0xff] }
 0x192   : > { %v1251_v57 = vsel %vm1247_vm8, %v1246_v52, %v1242_v53 }
 0x193   : > { %v1032_v8 = vmax.f32 %v1023_v1, 0.0 }
 0x195   : > { %1082 = vmatprep.subr.mxu1 %v1032_v8  ;;  %v1240_v55 = vpop.permute.xlu1 %1239 }
 0x196   : > { %1083 = vmatpush1.msra.mxu1 %v1031_v10 }
 0x197   : > { %1084 = vmatprep.subr.mxu1 %v1030_v12 }
 0x198   : > { %1085 = vmatpush1.msra.mxu1 %v1029_v14 }
 0x199   : > { %1086 = vmatprep.subr.mxu1 %v1028_v17  ;;  %v1468_v63 = vpop.permute.xlu1 %1467 }
 0x19a   : > { %1087 = vmatpush1.msra.mxu1 %v1027_v19 }
 0x19b   : > { %1088 = vmatprep.subr.mxu1 %v1026_v26 }
 0x19c   : > { %1089 = vmatpush1.msra.mxu1 %v1025_v28 }
 0x19d   : > { %2176 = vmatmul.mubr.msk.f32.vlgmr.msra.gmra.mxu1 %vm469_vm3, %v2172_v29  ;;  %1482 = vmatprep.subr.mxu1 %v2318_v0  ;;  %v1458_v8 = vpop.permute.xlu1 %1457 }
 0x19e   : > { %2261 = vmatpush1.msk.msra.mxu1 %vm1362_vm10, %v2716_v30  ;;  %1128 = vmatprep.mubr.f32.mxu1 %v2318_v0 }
 0x19f   : > { %1484 = vmatprep.subr.mxu1 %v2318_v0 }
 0x1a0   : > { %2262 = vmatpush1.msk.msra.mxu1 %vm1362_vm10, %v2730_v36  ;;  %vm1187_vm10 = vcmp.ge.s32.totalorder %v1185_v56, 0 }
 0x1a1   : > { %2177 = vmatmul.mubr.msk.f32.gmra.mxu1 %vm469_vm3, %v2173_v34  ;;  %1486 = vmatprep.subr.mxu1 %v2318_v0  ;;  %vm1193_vm12 = vmand %vm1179_vm5, %vm1187_vm10  ;;  %v2859_v11 = vpop.permute.xlu1 %1812 }
 0x1a2   : > { %2263 = vmatpush1.msk.msra.mxu1 %vm2735_vm14, %v2746_v39  ;;  %1134 = vmatprep.mubr.f32.mxu1 %v2318_v0 }
 0x1a3   : > { %1488 = vmatprep.subr.mxu1 %v2318_v0 }
 0x1a4   : > { %2264 = vmatpush1.msk.msra.mxu1 %vm2735_vm14, %v1174_v40 }
 0x1a5   : > { %2178 = vmatmul.mubr.msk.f32.gmra.mxu1 %vm469_vm3, %v2174_v25  ;;  %2265 = vmatprep.subr.msk.mxu1 %vm1257_vm1, %v1323_v43  ;;  %v2863_v15 = vpop.permute.xlu1 %1802 }
 0x1a6   : > { %2266 = vmatpush1.msk.msra.mxu1 %vm1256_vm2, %v1321_v44  ;;  %1140 = vmatprep.mubr.f32.mxu1 %v2318_v0 }
 0x1a7   : > { %2267 = vmatprep.subr.msk.mxu1 %vm1257_vm1, %v1322_v45 }
 0x1a8   : > { %2268 = vmatpush1.msk.msra.mxu1 %vm1256_vm2, %v1320_v49 }
 0x1a9   : > { %2179 = vmatmul.mubr.msk.f32.gmra.mxu1 %vm469_vm3, %v2175_v46  ;;  %1494 = vmatprep.subr.mxu1 %v2389_v2  ;;  %v1291_v2 = vsel %vm1290_vm4, %v1283_v42, %v1287_v41  ;;  %v452_v18 = vpop.permute.xlu1 %451 }
 0x1aa   : > { %1495 = vmatpush1.msra.mxu1 %v2392_v3  ;;  %2192 = vmatprep.mubr.msk.f32.mxu1 %vm331_vm0, %v2181_v31  ;;  %v1220_v3 = vadd.s32 4294967104, %v2500_v21  ;;  %v2183_v21 = vld [vmem:[%s3022_s2 + $0x58] sm:$0xff] }
 0x1ab   : > { %1496 = vmatprep.subr.mxu1 %v2400_v5  ;;  %v1244_v5 = vpop.permute.xlu0 %1243 }
 0x1ac   : > { %1497 = vmatpush1.msra.mxu1 %v2395_v4  ;;  %v1293_v4 = vsel %vm1290_vm4, %v1287_v41, %v1283_v42  ;;  %v1250_v58 = vsel %vm1247_vm8, %v1244_v5, %v1240_v55  ;;  %vm1222_vm9 = vcmp.ge.s32.totalorder %v1220_v3, 0 }
 0x1ad   : > { %2269 = vmatprep.subr.msk.mxu1 %vm1179_vm5, %v1292_v22  ;;  %v462_v37 = vpop.permute.xlu1 %461 }
 0x1ae   : > { %2270 = vmatpush1.msk.msra.mxu1 %vm1178_vm11, %v1294_v54  ;;  %v548_v62 = vpop.f32.mrf.mxu1 }
 0x1af   : > { %2271 = vmatprep.subr.msk.mxu1 %vm1179_vm5, %v1291_v2  ;;  %v1463_v6 = vpop.permute.xlu0 %1462  ;;  %v549_v23 = vadd.f32 %v548_v62, %v452_v18 }
 0x1b0   : > { %2272 = vmatpush1.msk.msra.mxu1 %vm1178_vm11, %v1293_v4  ;;  %vm1382_vm11 = vcmp.lt.s32.totalorder %v1378_v27, 256  ;;  %v550_v1 = vpop.f32.mrf.mxu1 }
 0x1b1   : > { %2273 = vmatprep.subr.msk.mxu1 %vm1269_vm7, %v1251_v57  ;;  %vm1386_vm13 = vmand %vm1256_vm2, %vm1382_vm11  ;;  %v551_v26 = vadd.f32 %v550_v1, %v452_v18  ;;  %v2205_v18 = vld [vmem:[%s3022_s2 + $0x88] sm:$0xff] }
 0x1b2   : > { %1503 = vmatpush1.msra.mxu1 %v2318_v0  ;;  %v554_v7 = vpop.f32.mrf.mxu1 }
 0x1b3   : > { %2274 = vmatprep.subr.msk.mxu1 %vm1269_vm7, %v1250_v58  ;;  %v1453_v10 = vpop.permute.xlu0 %1452 }
 0x1b4   : > { %1505 = vmatpush1.msra.mxu1 %v2318_v0  ;;  %v556_v9 = vpop.f32.mrf.mxu1 }
 0x1b5   : > { %2275 = vmatprep.subr.msk.mxu1 %vm1222_vm9, %v2716_v30 }
 0x1b6   : > { %1507 = vmatpush1.msra.mxu1 %v2318_v0  ;;  %v560_v12 = vpop.f32.mrf.mxu1 }
 0x1b7   : > { %2276 = vmatprep.subr.msk.mxu1 %vm1222_vm9, %v2730_v36  ;;  %v2861_v13 = vpop.permute.xlu0 %1807 }
 0x1b8   : > { %1509 = vmatpush1.msra.mxu1 %v2318_v0  ;;  %v562_v14 = vpop.f32.mrf.mxu1 }
 0x1b9   : > { %2277 = vmatprep.subr.msk.mxu1 %vm1193_vm12, %v2746_v39  ;;  %v561_v39 = vadd.f32 %v560_v12, %v462_v37  ;;  %v563_v41 = vadd.f32 %v562_v14, %v462_v37  ;;  %v2309_v12 = vld [vmem:[%s2386_s26] sm:$0xff]  ;;  %v2198_v14 = vld [vmem:[%s3024_s4 + $0x50] sm:$0xff] }
 0x1ba   : > { %1511 = vmatpush1.msra.mxu1 %v2318_v0  ;;  %v566_v16 = vpop.f32.mrf.mxu1 }
 0x1bb   : > { %2278 = vmatprep.subr.msk.mxu1 %vm1193_vm12, %v1174_v40  ;;  %v2865_v17 = vpop.permute.xlu0 %1797 }
 0x1bc   : > { %1513 = vmatpush1.msra.mxu1 %v2318_v0  ;;  %v2867_v19 = vpop.f32.mrf.mxu1 }
 0x1bd   : > { %1542 = vmatprep.subr.mxu1 %v2318_v0 }
 0x1be   : > { %2279 = vmatpush2.msk.msra.mxu1 %vm1386_vm13, %v1251_v57 }
 0x1bf   : > { %1544 = vmatprep.subr.mxu1 %v2318_v0  ;;  %v457_v29 = vpop.permute.xlu0 %456 }
 0x1c0   : > { %2280 = vmatpush2.msk.msra.mxu1 %vm1386_vm13, %v1250_v58  ;;  %v555_v32 = vadd.f32 %v554_v7, %v457_v29  ;;  %v557_v35 = vadd.f32 %v556_v9, %v457_v29  ;;  %v2306_v7 = vld [vmem:[%s2386_s26 + $0x18] sm:$0xff]  ;;  %v2197_v9 = vld [vmem:[%s3024_s4 + $0x48] sm:$0xff] }
 0x1c1   : > { %1547 = vmatmul.mubr.f32.vlgmr.msra.gmra.mxu1 %v2180_v20  ;;  %v2209_v29 = vld [vmem:[%s3022_s2 + $0xa8] sm:$0xff] }
 0x1c2   : > { %2193 = vmatprep.mubr.msk.f32.mxu1 %vm331_vm0, %v2183_v21 }
 0x1c3   : > { %v2879_v43 = vpop.permute.xlu0 %466 }
 0x1c4   : > { %v567_v45 = vadd.f32 %v566_v16, %v2879_v43  ;;  %v2199_v16 = vld [vmem:[%s3024_s4 + $0x58] sm:$0xff] }
 0x1c5   : > { %1553 = vmatmul.mubr.f32.gmra.mxu1 %v2182_v47 }
 0x1c6   : > { %2194 = vmatprep.mubr.msk.f32.mxu1 %vm331_vm0, %v2185_v59 }
 0x1c9   : > { %1559 = vmatmul.mubr.f32.gmra.mxu1 %v2184_v60 }
 0x1ca   : > { %2195 = vmatprep.mubr.msk.f32.mxu1 %vm331_vm0, %v2187_v61 }
 0x1cd   : > { %1565 = vmatmul.mubr.f32.gmra.mxu1 %v2186_v50 }
 0x1ce   : > { %2013 = vmatprep.mubr.f32.mxu1 %v2318_v0 }
 0x25d   : > { %v1124_v24 = vpop.f32.mrf.mxu1 }
 0x25e   : > { %v2869_v28 = vadd.f32 %v1124_v24, %v549_v23  ;;  %v2204_v23 = vld [vmem:[%s3022_s2 + $0x80] sm:$0xff]  ;;  %v2207_v24 = vld [vmem:[%s3022_s2 + $0x98] sm:$0xff] }
 0x25f   : > { %v1126_v30 = vpop.f32.mrf.mxu1 }
 0x260   : > { %v2871_v33 = vadd.f32 %v1126_v30, %v551_v26  ;;  %v2206_v26 = vld [vmem:[%s3022_s2 + $0x90] sm:$0xff]  ;;  %v2208_v30 = vld [vmem:[%s3022_s2 + $0xa0] sm:$0xff] }
 0x261   : > { %v1130_v34 = vpop.f32.mrf.mxu1 }
 0x262   : > { %v2873_v36 = vadd.f32 %v1130_v34, %v555_v32  ;;  %v2211_v32 = vld [vmem:[%s3022_s2 + $0xb8] sm:$0xff]  ;;  %v2210_v34 = vld [vmem:[%s3022_s2 + $0xb0] sm:$0xff] }
 0x263   : > { %v1132_v38 = vpop.f32.mrf.mxu1 }
 0x264   : > { %v2875_v25 = vadd.f32 %v1132_v38, %v557_v35 }
 0x265   : > { %v1136_v40 = vpop.f32.mrf.mxu1 }
 0x266   : > { %v2877_v42 = vadd.f32 %v1136_v40, %v561_v39 }
 0x267   : > { %v1138_v44 = vpop.f32.mrf.mxu1 }
 0x268   : > { %v2882_v46 = vadd.f32 %v1138_v44, %v563_v41 }
 0x269   : > { %v1142_v48 = vpop.f32.mrf.mxu1 }
 0x26a   : > { %v2884_v49 = vadd.f32 %v1142_v48, %v567_v45 }
 0x26b   : > { %v2886_v51 = vpop.f32.mrf.mxu1 }
 0x281   : > { %v1548_v31 = vpop.f32.mrf.mxu1 }
 0x282   : > { %v1549_v60 = vadd.f32 %v1548_v31, %v1453_v10 }
 0x283   : > { %v1550_v52 = vpop.f32.mrf.mxu1 }
 0x284   : > { %v1551_v47 = vadd.f32 %v1550_v52, %v1453_v10  ;;  %v2308_v10 = vld [vmem:[%s2386_s26 + $0x8] sm:$0xff] }
 0x285   : > { %v1554_v53 = vpop.f32.mrf.mxu1 }
 0x286   : > { %v1555_v20 = vadd.f32 %v1554_v53, %v1458_v8  ;;  %v1572_v1 = vmax.f32 %v1551_v47, 0.0 }
 0x287   : > { %v1556_v22 = vpop.f32.mrf.mxu1 }
 0x288   : > { %v1557_v58 = vadd.f32 %v1556_v22, %v1458_v8  ;;  %v1573_v62 = vmax.f32 %v1555_v20, 0.0  ;;  %v2307_v8 = vld [vmem:[%s2386_s26 + $0x10] sm:$0xff] }
 0x289   : > { %v1560_v54 = vpop.f32.mrf.mxu1 }
 0x28a   : > { %v1561_v57 = vadd.f32 %v1560_v54, %v1463_v6  ;;  %v1574_v50 = vmax.f32 %v1557_v58, 0.0 }
 0x28b   : > { %v1562_v2 = vpop.f32.mrf.mxu1 }
 0x28c   : > { %v1563_v55 = vadd.f32 %v1562_v2, %v1463_v6  ;;  %v1575_v61 = vmax.f32 %v1561_v57, 0.0  ;;  %v2196_v6 = vld [vmem:[%s3024_s4 + $0x40] sm:$0xff] }
 0x28d   : > { %v1566_v3 = vpop.f32.mrf.mxu1 }
 0x28e   : > { %v1567_v4 = vadd.f32 %v1566_v3, %v1468_v63  ;;  %v1576_v59 = vmax.f32 %v1563_v55, 0.0 }
 0x28f   : > { %v1568_v5 = vpop.f32.mrf.mxu1 }
 0x290   : > { %v1569_v56 = vadd.f32 %v1568_v5, %v1468_v63  ;;  %v1577_v21 = vmax.f32 %v1567_v4, 0.0  ;;  %v1571_v63 = vmax.f32 %v1549_v60, 0.0 }
 0x292   : > { %v1578_v27 = vmax.f32 %v1569_v56, 0.0 }
 0x294   : > { %1628 = vmatprep.subr.mxu0 %v1578_v27 }
 0x295   : > { %1629 = vmatpush1.msra.mxu0 %v1577_v21 }
 0x296   : > { %1630 = vmatprep.subr.mxu0 %v1576_v59 }
 0x297   : > { %1631 = vmatpush1.msra.mxu0 %v1575_v61 }
 0x298   : > { %1632 = vmatprep.subr.mxu0 %v1574_v50 }
 0x299   : > { %1633 = vmatpush1.msra.mxu0 %v1573_v62  ;;  %v2222_v62 = vld [vmem:[%s3024_s4 + $0x70] sm:$0xff] }
 0x29a   : > { %1634 = vmatprep.subr.mxu0 %v1572_v1  ;;  %v2223_v1 = vld [vmem:[%s3024_s4 + $0x78] sm:$0xff] }
 0x29b   : > { %1635 = vmatpush1.msra.mxu0 %v1571_v63 }
 0x29c   : > { %2200 = vmatmul.mubr.msk.f32.vlgmr.msra.gmra.mxu0 %vm469_vm3, %v2196_v6  ;;  %1839 = vmatprep.subr.mxu0 %v2306_v7 }
 0x29d   : > { %1840 = vmatpush1.msra.mxu0 %v2307_v8  ;;  %1674 = vmatprep.mubr.f32.mxu0 %v2318_v0 }
 0x29e   : > { %1841 = vmatprep.subr.mxu0 %v2308_v10 }
 0x29f   : > { %1842 = vmatpush1.msra.mxu0 %v2309_v12 }
 0x2a0   : > { %2201 = vmatmul.mubr.msk.f32.gmra.mxu0 %vm469_vm3, %v2197_v9  ;;  %1843 = vmatprep.subr.mxu0 %v2318_v0 }
 0x2a1   : > { %1844 = vmatpush1.msra.mxu0 %v2318_v0  ;;  %1680 = vmatprep.mubr.f32.mxu0 %v2318_v0 }
 0x2a2   : > { %1845 = vmatprep.subr.mxu0 %v2318_v0 }
 0x2a3   : > { %1846 = vmatpush1.msra.mxu0 %v2318_v0 }
 0x2a4   : > { %2202 = vmatmul.mubr.msk.f32.gmra.mxu0 %vm469_vm3, %v2198_v14  ;;  %1847 = vmatprep.subr.mxu0 %v2318_v0 }
 0x2a5   : > { %1848 = vmatpush1.msra.mxu0 %v2318_v0  ;;  %1686 = vmatprep.mubr.f32.mxu0 %v2318_v0 }
 0x2a6   : > { %1849 = vmatprep.subr.mxu0 %v2318_v0 }
 0x2a7   : > { %1850 = vmatpush1.msra.mxu0 %v2318_v0 }
 0x2a8   : > { %2203 = vmatmul.mubr.msk.f32.gmra.mxu0 %vm469_vm3, %v2199_v16  ;;  %1851 = vmatprep.subr.mxu0 %v2318_v0 }
 0x2a9   : > { %1852 = vmatpush1.msra.mxu0 %v2318_v0  ;;  %2216 = vmatprep.mubr.msk.f32.mxu0 %vm331_vm0, %v2205_v18 }
 0x2aa   : > { %1853 = vmatprep.subr.mxu0 %v2318_v0 }
 0x2ab   : > { %1854 = vmatpush1.msra.mxu0 %v2318_v0 }
 0x2ac   : > { %1855 = vmatprep.subr.mxu0 %v2318_v0 }
 0x2ad   : > { %1856 = vmatpush1.msra.mxu0 %v2318_v0 }
 0x2ae   : > { %1857 = vmatprep.subr.mxu0 %v2318_v0 }
 0x2af   : > { %1858 = vmatpush1.msra.mxu0 %v2318_v0 }
 0x2b0   : > { %1892 = vmatmul.mubr.f32.vlgmr.msra.gmra.mxu0 %v2204_v23 }
 0x2b1   : > { %2217 = vmatprep.mubr.msk.f32.mxu0 %vm331_vm0, %v2207_v24 }
 0x2b4   : > { %1898 = vmatmul.mubr.f32.gmra.mxu0 %v2206_v26 }
 0x2b5   : > { %2218 = vmatprep.mubr.msk.f32.mxu0 %vm331_vm0, %v2209_v29 }
 0x2b8   : > { %1904 = vmatmul.mubr.f32.gmra.mxu0 %v2208_v30 }
 0x2b9   : > { %2219 = vmatprep.mubr.msk.f32.mxu0 %vm331_vm0, %v2211_v32 }
 0x2bc   : > { %1910 = vmatmul.mubr.f32.gmra.mxu0 %v2210_v34 }
 0x35c   : > { %v1670_v35 = vpop.f32.mrf.mxu0 }
 0x35d   : > { %v1693_v37 = vadd.f32 %v1670_v35, %v2869_v28  ;;  %v569_v28 = vadd.f32 %v2867_v19, %v2879_v43 }
 0x35e   : > { %v1672_v38 = vpop.f32.mrf.mxu0 }
 0x35f   : > { %v2957_v39 = vadd.f32 %v1672_v38, %v2871_v33  ;;  %v1154_v22 = vadd.f32 %v2886_v51, %v569_v28 }
 0x360   : > { %v1676_v40 = vpop.f32.mrf.mxu0 }
 0x361   : > { %v2960_v41 = vadd.f32 %v1676_v40, %v2873_v36 }
 0x362   : > { %v1678_v44 = vpop.f32.mrf.mxu0 }
 0x363   : > { %v2963_v45 = vadd.f32 %v1678_v44, %v2875_v25 }
 0x364   : > { %v1682_v48 = vpop.f32.mrf.mxu0 }
 0x365   : > { %v2966_v31 = vadd.f32 %v1682_v48, %v2877_v42 }
 0x366   : > { %v1684_v52 = vpop.f32.mrf.mxu0 }
 0x367   : > { %v2971_v53 = vadd.f32 %v1684_v52, %v2882_v46 }
 0x368   : > { %v1688_v33 = vpop.f32.mrf.mxu0 }
 0x369   : > { %v2975_v36 = vadd.f32 %v1688_v33, %v2884_v49 }
 0x36a   : > { %v1690_v54 = vpop.f32.mrf.mxu0 }
 0x36b   : > { %v2977_v25 = vadd.f32 %v1690_v54, %v1154_v22 }
 0x370   : > { %v1893_v2 = vpop.f32.mrf.mxu0 }
 0x371   : > { %v1894_v59 = vadd.f32 %v1893_v2, %v2865_v17 }
 0x372   : > { %v1895_v3 = vpop.f32.mrf.mxu0 }
 0x373   : > { %v1896_v21 = vadd.f32 %v1895_v3, %v2865_v17  ;;  %v2221_v17 = vld [vmem:[%s3024_s4 + $0x68] sm:$0xff] }
 0x374   : > { %v1899_v42 = vpop.f32.mrf.mxu0 }
 0x375   : > { %v1900_v27 = vadd.f32 %v1899_v42, %v2863_v15 }
 0x376   : > { %v1901_v4 = vpop.f32.mrf.mxu0 }
 0x377   : > { %v1902_v57 = vadd.f32 %v1901_v4, %v2863_v15  ;;  %v1918_v50 = vmax.f32 %v1900_v27, 0.0  ;;  %v2220_v15 = vld [vmem:[%s3024_s4 + $0x60] sm:$0xff] }
 0x378   : > { %v1905_v5 = vpop.f32.mrf.mxu0 }
 0x379   : > { %v1906_v49 = vadd.f32 %v1905_v5, %v2861_v13  ;;  %v1919_v61 = vmax.f32 %v1902_v57, 0.0 }
 0x37a   : > { %v1907_v55 = vpop.f32.mrf.mxu0 }
 0x37b   : > { %v1908_v46 = vadd.f32 %v1907_v55, %v2861_v13  ;;  %v1920_v60 = vmax.f32 %v1906_v49, 0.0  ;;  %v1916_v13 = vmax.f32 %v1894_v59, 0.0 }
 0x37c   : > { %v1911_v56 = vpop.f32.mrf.mxu0 }
 0x37d   : > { %v1912_v19 = vadd.f32 %v1911_v56, %v2859_v11  ;;  %v1921_v47 = vmax.f32 %v1908_v46, 0.0 }
 0x37e   : > { %v1913_v43 = vpop.f32.mrf.mxu0 }
 0x37f   : > { %v1914_v51 = vadd.f32 %v1913_v43, %v2859_v11  ;;  %v1922_v20 = vmax.f32 %v1912_v19, 0.0  ;;  %v1917_v11 = vmax.f32 %v1896_v21, 0.0 }
 0x381   : > { %v1923_v58 = vmax.f32 %v1914_v51, 0.0 }
 0x383   : > { %1973 = vmatprep.subr.mxu1 %v1923_v58 }
 0x384   : > { %1974 = vmatpush1.msra.mxu1 %v1922_v20 }
 0x385   : > { %1975 = vmatprep.subr.mxu1 %v1921_v47 }
 0x386   : > { %1976 = vmatpush1.msra.mxu1 %v1920_v60 }
 0x387   : > { %1977 = vmatprep.subr.mxu1 %v1919_v61 }
 0x388   : > { %1978 = vmatpush1.msra.mxu1 %v1918_v50 }
 0x389   : > { %1979 = vmatprep.subr.mxu1 %v1917_v11 }
 0x38a   : > { %1980 = vmatpush1.msra.mxu1 %v1916_v13 }
 0x38b   : > { %2224 = vmatmul.mubr.msk.f32.vlgmr.msra.gmra.mxu1 %vm469_vm3, %v2220_v15 }
 0x38c   : > { %2019 = vmatprep.mubr.f32.mxu1 %v2318_v0 }
 0x38f   : > { %2225 = vmatmul.mubr.msk.f32.gmra.mxu1 %vm469_vm3, %v2221_v17 }
 0x390   : > { %2025 = vmatprep.mubr.f32.mxu1 %v2318_v0 }
 0x393   : > { %2226 = vmatmul.mubr.msk.f32.gmra.mxu1 %vm469_vm3, %v2222_v62 }
 0x394   : > { %2031 = vmatprep.mubr.f32.mxu1 %v2318_v0 }
 0x397   : > { %2227 = vmatmul.mubr.msk.f32.gmra.mxu1 %vm469_vm3, %v2223_v1 }
 0x44b   : > { %v2015_v63 = vpop.f32.mrf.mxu1 }
 0x44c   : > { %v2038_v6 = vadd.f32 %v2015_v63, %v1693_v37 }
 0x44d   : > { %v2017_v7 = vpop.f32.mrf.mxu1 }
 0x44e   : > { %v2062_v8 = vmax.f32 %v2038_v6, 0.0  ;;  %v2039_v9 = vadd.f32 %v2017_v7, %v2957_v39 }
 0x44f   : > { %v2021_v10 = vpop.f32.mrf.mxu1 }
 0x450   : > { %2070 = vst [vmem:[%s271_s16] sm:$0xff] %v2062_v8  ;;  %v2063_v0 = vmax.f32 %v2039_v9, 0.0  ;;  %v2040_v12 = vadd.f32 %v2021_v10, %v2960_v41 }
 0x451   : > { %v2023_v14 = vpop.f32.mrf.mxu1 }
 0x452   : > { %2071 = vst [vmem:[%s271_s16 + $0x8] sm:$0xff] %v2063_v0  ;;  %v2064_v16 = vmax.f32 %v2040_v12, 0.0  ;;  %v2041_v18 = vadd.f32 %v2023_v14, %v2963_v45 }
 0x453   : > { %v2027_v23 = vpop.f32.mrf.mxu1 }
 0x454   : > { %2072 = vst [vmem:[%s271_s16 + $0x10] sm:$0xff] %v2064_v16  ;;  %v2065_v24 = vmax.f32 %v2041_v18, 0.0  ;;  %v2042_v26 = vadd.f32 %v2027_v23, %v2966_v31 }
 0x455   : > { %v2029_v29 = vpop.f32.mrf.mxu1 }
 0x456   : > { %2073 = vst [vmem:[%s271_s16 + $0x18] sm:$0xff] %v2065_v24  ;;  %v2066_v30 = vmax.f32 %v2042_v26, 0.0  ;;  %v2043_v32 = vadd.f32 %v2029_v29, %v2971_v53 }
 0x457   : > { %v2033_v34 = vpop.f32.mrf.mxu1 }
 0x458   : > { %2074 = vst [vmem:[%s271_s16 + $0x20] sm:$0xff] %v2066_v30  ;;  %v2067_v35 = vmax.f32 %v2043_v32, 0.0  ;;  %v2044_v37 = vadd.f32 %v2033_v34, %v2975_v36 }
 0x459   : > { %v2035_v38 = vpop.f32.mrf.mxu1 }
 0x45a   : > { %2075 = vst [vmem:[%s271_s16 + $0x28] sm:$0xff] %v2067_v35  ;;  %v2068_v39 = vmax.f32 %v2044_v37, 0.0  ;;  %v2045_v40 = vadd.f32 %v2035_v38, %v2977_v25 }
 0x45c   : > { %2076 = vst [vmem:[%s271_s16 + $0x30] sm:$0xff] %v2068_v39  ;;  %v2069_v41 = vmax.f32 %v2045_v40, 0.0 }
 0x45e   : > { %2077 = vst [vmem:[%s271_s16 + $0x38] sm:$0xff] %v2069_v41 }
 0x45f PF: > { %s16_s21 = sadd.s32 1, %s2316_s21  }
 0x460   : > { %p13_p4 = scmp.ge.s32.totalorder %s16_s21, 4  }
 0x462   :  { %15 = sbr.rel (!%p13_p4) target bundleno = 1 (0x1), region = 85 }

</bundles_post_ra>
